<compile_context>
chip_gen: v7x
topology: tpu7x:2x2x1
jax: 0.10.0
libtpu: 0.0.40
codegen_flags: <defaults>
</compile_context>

<pallas_src>
import math

import jax
import jax.numpy as jnp
from jax import lax
from jax.experimental import pallas as pl
from jax.experimental.pallas import tpu as pltpu


def dir_rw_gcn_kernel(a_row_ref, a_col_ref, p1_ref, p2_ref,
                      inv_out_ref, inv_in_ref, b_ref, out_ref,
                      acc1_ref, acc2_ref):
    """Grid = (row blocks i, reduction blocks k); k is the inner/arbitrary axis.

    a_row_ref : A[i*tm:(i+1)*tm, k*tk:(k+1)*tk]        (tm, tk)
    a_col_ref : A[k*tk:(k+1)*tk, i*tm:(i+1)*tm]        (tk, tm)  -> used as A^T tile
    p1_ref    : (x @ alpha*W1^T)[k block]              (tk, Dp)
    p2_ref    : (x @ (1-alpha)*W2^T)[k block]          (tk, Dp)
    inv_out   : 1/deg_out for rows i                   (tm, 1)
    inv_in    : 1/deg_in  for rows i                   (tm, 1)
    b_ref     : alpha*b1 + (1-alpha)*b2                (1, Dp)
    """
    k = pl.program_id(1)

    @pl.when(k == 0)
    def _init():
        acc1_ref[...] = jnp.zeros_like(acc1_ref)
        acc2_ref[...] = jnp.zeros_like(acc2_ref)

    # h1 partial: A[i, k] @ p1[k]          -> rows i            (MXU)
    acc1_ref[...] += jnp.dot(a_row_ref[...], p1_ref[...],
                             preferred_element_type=jnp.float32)

    # h2 partial: A[k, i]^T @ p2[k] == (A^T)[i, k] @ p2[k]
    # Contract on axis 0 of both operands: the MXU does the "transpose" for
    # free, no XLU vxpose and no N^2 temporary.
    acc2_ref[...] += lax.dot_general(
        a_col_ref[...], p2_ref[...],
        dimension_numbers=(((0,), (0,)), ((), ())),
        preferred_element_type=jnp.float32)

    @pl.when(k == pl.num_programs(1) - 1)
    def _finalize():
        out_ref[...] = (inv_out_ref[...] * acc1_ref[...]
                        + inv_in_ref[...] * acc2_ref[...]
                        + b_ref[...]).astype(out_ref.dtype)


def dir_rw_gcn_conv(x, edge_index, w_s2d, b_s2d, w_d2s, b_d2s, alpha,
                    *, tm=128, tk=128):
    """x: [N, Din] f32, edge_index: [2, E] int32,
    w_*: [Dout, Din] (PyTorch Linear layout), b_*: [Dout]."""
    N, Din = x.shape
    Dout = w_s2d.shape[0]
    alpha = float(alpha)
    x = x.astype(jnp.float32)

    row, col = edge_index[0], edge_index[1]
    ones = jnp.ones(row.shape, jnp.float32)

    # O(E) degree computation (instead of in-kernel N^2 reductions).
    deg_out = jnp.zeros((N,), jnp.float32).at[row].add(ones)   # row sums of A
    deg_in = jnp.zeros((N,), jnp.float32).at[col].add(ones)    # col sums of A
    inv_out = jnp.where(deg_out > 0, 1.0 / deg_out, 0.0)
    inv_in = jnp.where(deg_in > 0, 1.0 / deg_in, 0.0)

    # Fold linear layers + alpha blend into the features / bias.
    p1 = (x @ w_s2d.T.astype(jnp.float32)) * alpha               # [N, Dout]
    p2 = (x @ w_d2s.T.astype(jnp.float32)) * (1.0 - alpha)       # [N, Dout]
    bias = (alpha * b_s2d + (1.0 - alpha) * b_d2s).astype(jnp.float32)

    # Padding: node axis to a multiple of both tiles, feature axis lane-dense
    # (multiple of 128) so the output write-back uses full, unmasked vst.
    t = math.lcm(tm, tk)
    Np = ((N + t - 1) // t) * t
    Dp = ((Dout + 127) // 128) * 128

    # Glue: dense adjacency from the edge list (duplicate edges sum, matching
    # a coalesced SparseTensor with unit values).
    A = jnp.zeros((Np, Np), jnp.float32).at[row, col].add(ones)

    p1p = jnp.zeros((Np, Dp), jnp.float32).at[:N, :Dout].set(p1)
    p2p = jnp.zeros((Np, Dp), jnp.float32).at[:N, :Dout].set(p2)
    inv_out_p = jnp.zeros((Np, 1), jnp.float32).at[:N, 0].set(inv_out)
    inv_in_p = jnp.zeros((Np, 1), jnp.float32).at[:N, 0].set(inv_in)
    bias_p = jnp.zeros((1, Dp), jnp.float32).at[0, :Dout].set(bias)

    grid = (Np // tm, Np // tk)  # (parallel rows, arbitrary reduction)

    out = pl.pallas_call(
        dir_rw_gcn_kernel,
        out_shape=jax.ShapeDtypeStruct((Np, Dp), jnp.float32),
        grid_spec=pltpu.PrefetchScalarGridSpec(
            num_scalar_prefetch=0,
            grid=grid,
            in_specs=[
                pl.BlockSpec((tm, tk), lambda i, k: (i, k)),   # A row tile
                pl.BlockSpec((tk, tm), lambda i, k: (k, i)),   # A col tile (A^T term)
                pl.BlockSpec((tk, Dp), lambda i, k: (k, 0)),   # p1
                pl.BlockSpec((tk, Dp), lambda i, k: (k, 0)),   # p2
                pl.BlockSpec((tm, 1), lambda i, k: (i, 0)),    # inv_out
                pl.BlockSpec((tm, 1), lambda i, k: (i, 0)),    # inv_in
                pl.BlockSpec((1, Dp), lambda i, k: (0, 0)),    # blended bias
            ],
            out_specs=pl.BlockSpec((tm, Dp), lambda i, k: (i, 0)),
            scratch_shapes=[pltpu.VMEM((tm, Dp), jnp.float32),
                            pltpu.VMEM((tm, Dp), jnp.float32)],
        ),
        compiler_params=pltpu.CompilerParams(
            dimension_semantics=("parallel", "arbitrary")),
    )(A, A, p1p, p2p, inv_out_p, inv_in_p, bias_p)

    return out[:N, :Dout]


def reference(x, edge_index, w_s2d, b_s2d, w_d2s, b_d2s, alpha):
    N = x.shape[0]
    row, col = edge_index[0], edge_index[1]
    A = jnp.zeros((N, N), jnp.float32).at[row, col].add(1.0)
    deg_out = A.sum(1, keepdims=True)
    A_rw = A * jnp.where(deg_out > 0, 1.0 / deg_out, 0.0)
    At = A.T
    deg_in = At.sum(1, keepdims=True)
    At_rw = At * jnp.where(deg_in > 0, 1.0 / deg_in, 0.0)
    y1 = (A_rw @ x) @ w_s2d.T + b_s2d
    y2 = (At_rw @ x) @ w_d2s.T + b_d2s
    return alpha * y1 + (1.0 - alpha) * y2


if __name__ == "__main__":
    # Small deterministic example consistent with the module:
    # N nodes, input_dim -> output_dim, alpha blend.
    N, Din, Dout, E = 256, 32, 32, 1024
    alpha = 0.7

    key = jax.random.PRNGKey(0)
    k_x, k_e1, k_e2, k_w1, k_b1, k_w2, k_b2 = jax.random.split(key, 7)

    x = jax.random.normal(k_x, (N, Din), jnp.float32)
    row = jax.random.randint(k_e1, (E,), 0, N, jnp.int32)
    col = jax.random.randint(k_e2, (E,), 0, N, jnp.int32)
    edge_index = jnp.stack([row, col], axis=0)

    # Deterministic Linear params (PyTorch layout: weight [out, in], bias [out]).
    bound = 1.0 / (Din ** 0.5)
    w_s2d = jax.random.uniform(k_w1, (Dout, Din), jnp.float32, -bound, bound)
    b_s2d = jax.random.uniform(k_b1, (Dout,), jnp.float32, -bound, bound)
    w_d2s = jax.random.uniform(k_w2, (Dout, Din), jnp.float32, -bound, bound)
    b_d2s = jax.random.uniform(k_b2, (Dout,), jnp.float32, -bound, bound)

    out = dir_rw_gcn_conv(x, edge_index, w_s2d, b_s2d, w_d2s, b_d2s, alpha)
    out = jax.block_until_ready(out)

    ref = reference(x, edge_index, w_s2d, b_s2d, w_d2s, b_d2s, alpha)
    assert out.shape == (N, Dout)
    assert jnp.allclose(out, ref, atol=1e-4, rtol=1e-4), "mismatch vs reference"

    print("KERNEL_OK")
</pallas_src>

<mosaic_0001>
module attributes {stable_mosaic.version = 11 : i64} {
  func.func @dir_rw_gcn_kernel(%arg0: i32, %arg1: i32, %arg2: memref<128x128xf32, #tpu.memory_space<vmem>>, %arg3: memref<128x128xf32, #tpu.memory_space<vmem>>, %arg4: memref<128x128xf32, #tpu.memory_space<vmem>>, %arg5: memref<128x128xf32, #tpu.memory_space<vmem>>, %arg6: memref<128x1xf32, #tpu.memory_space<vmem>>, %arg7: memref<128x1xf32, #tpu.memory_space<vmem>>, %arg8: memref<1x128xf32, #tpu.memory_space<vmem>>, %arg9: memref<128x128xf32, #tpu.memory_space<vmem>>, %arg10: memref<128x128xf32, #tpu.memory_space<vmem>>, %arg11: memref<128x128xf32, #tpu.memory_space<vmem>>) attributes {dimension_semantics = [#tpu.dimension_semantics<parallel>, #tpu.dimension_semantics<arbitrary>], iteration_bounds = array<i64: 2, 2>, scalar_prefetch = 0 : i64, scratch_operands = 2 : i64, tpu.core_type = #tpu.core_type<tc>, window_params = [{transform_indices = @transform_0, window_bounds = array<i64: 128, 128>}, {transform_indices = @transform_1, window_bounds = array<i64: 128, 128>}, {transform_indices = @transform_2, window_bounds = array<i64: 128, 128>}, {transform_indices = @transform_3, window_bounds = array<i64: 128, 128>}, {transform_indices = @transform_4, window_bounds = array<i64: 128, 1>}, {transform_indices = @transform_5, window_bounds = array<i64: 128, 1>}, {pipeline_mode = #tpu.pipeline_mode<synchronous>, transform_indices = @transform_6, window_bounds = array<i64: 1, 128>}, {transform_indices = @transform_7, window_bounds = array<i64: 128, 128>}]} {
    %c0_i32 = arith.constant 0 : i32
    %0 = arith.cmpi eq, %arg1, %c0_i32 : i32
    %1 = arith.extui %0 : i1 to i32
    %c0_i32_0 = arith.constant 0 : i32
    %2 = arith.cmpi ne, %1, %c0_i32_0 : i32
    scf.if %2 {
      %cst_18 = arith.constant 0.000000e+00 : f32
      %18 = vector.broadcast %cst_18 : f32 to vector<128x128xf32>
      %c0_19 = arith.constant 0 : index
      %c0_20 = arith.constant 0 : index
      %19 = vector.load %arg10[%c0_19, %c0_20] : memref<128x128xf32, #tpu.memory_space<vmem>>, vector<128x128xf32>
      tpu.vector_store %arg10[%c0_19, %c0_20], %18 {strides = array<i32>} : memref<128x128xf32, #tpu.memory_space<vmem>>, vector<128x128xf32>,
      %cst_21 = arith.constant 0.000000e+00 : f32
      %20 = vector.broadcast %cst_21 : f32 to vector<128x128xf32>
      %c0_22 = arith.constant 0 : index
      %c0_23 = arith.constant 0 : index
      %21 = vector.load %arg11[%c0_22, %c0_23] : memref<128x128xf32, #tpu.memory_space<vmem>>, vector<128x128xf32>
      tpu.vector_store %arg11[%c0_22, %c0_23], %20 {strides = array<i32>} : memref<128x128xf32, #tpu.memory_space<vmem>>, vector<128x128xf32>,
    } else {
    }
    %c0 = arith.constant 0 : index
    %c0_1 = arith.constant 0 : index
    %3 = vector.load %arg10[%c0, %c0_1] : memref<128x128xf32, #tpu.memory_space<vmem>>, vector<128x128xf32>
    %c0_2 = arith.constant 0 : index
    %c0_3 = arith.constant 0 : index
    %4 = vector.load %arg2[%c0_2, %c0_3] : memref<128x128xf32, #tpu.memory_space<vmem>>, vector<128x128xf32>
    %c0_4 = arith.constant 0 : index
    %c0_5 = arith.constant 0 : index
    %5 = vector.load %arg4[%c0_4, %c0_5] : memref<128x128xf32, #tpu.memory_space<vmem>>, vector<128x128xf32>
    %cst = arith.constant dense<0.000000e+00> : vector<128x128xf32>
    %6 = tpu.matmul %4, %5, %cst {dimension_numbers = #tpu.dot_dimension_numbers<[1], [0], [0], [1], [0, 0, 1, 1], [], []>} : vector<128x128xf32>, vector<128x128xf32>, vector<128x128xf32> -> vector<128x128xf32>
    %7 = arith.addf %3, %6 : vector<128x128xf32>
    %c0_6 = arith.constant 0 : index
    %c0_7 = arith.constant 0 : index
    %8 = vector.load %arg10[%c0_6, %c0_7] : memref<128x128xf32, #tpu.memory_space<vmem>>, vector<128x128xf32>
    tpu.vector_store %arg10[%c0_6, %c0_7], %7 {strides = array<i32>} : memref<128x128xf32, #tpu.memory_space<vmem>>, vector<128x128xf32>,
    %c0_8 = arith.constant 0 : index
    %c0_9 = arith.constant 0 : index
    %9 = vector.load %arg11[%c0_8, %c0_9] : memref<128x128xf32, #tpu.memory_space<vmem>>, vector<128x128xf32>
    %c0_10 = arith.constant 0 : index
    %c0_11 = arith.constant 0 : index
    %10 = vector.load %arg3[%c0_10, %c0_11] : memref<128x128xf32, #tpu.memory_space<vmem>>, vector<128x128xf32>
    %c0_12 = arith.constant 0 : index
    %c0_13 = arith.constant 0 : index
    %11 = vector.load %arg5[%c0_12, %c0_13] : memref<128x128xf32, #tpu.memory_space<vmem>>, vector<128x128xf32>
    %cst_14 = arith.constant dense<0.000000e+00> : vector<128x128xf32>
    %12 = tpu.matmul %10, %11, %cst_14 {dimension_numbers = #tpu.dot_dimension_numbers<[0], [0], [1], [1], [0, 1, 1, 1], [], []>} : vector<128x128xf32>, vector<128x128xf32>, vector<128x128xf32> -> vector<128x128xf32>
    %13 = arith.addf %9, %12 : vector<128x128xf32>
    %c0_15 = arith.constant 0 : index
    %c0_16 = arith.constant 0 : index
    %14 = vector.load %arg11[%c0_15, %c0_16] : memref<128x128xf32, #tpu.memory_space<vmem>>, vector<128x128xf32>
    tpu.vector_store %arg11[%c0_15, %c0_16], %13 {strides = array<i32>} : memref<128x128xf32, #tpu.memory_space<vmem>>, vector<128x128xf32>,
    %c1_i32 = arith.constant 1 : i32
    %15 = arith.cmpi eq, %arg1, %c1_i32 : i32
    %16 = arith.extui %15 : i1 to i32
    %c0_i32_17 = arith.constant 0 : i32
    %17 = arith.cmpi ne, %16, %c0_i32_17 : i32
    scf.if %17 {
      %c0_18 = arith.constant 0 : index
      %c0_19 = arith.constant 0 : index
      %18 = vector.load %arg6[%c0_18, %c0_19] : memref<128x1xf32, #tpu.memory_space<vmem>>, vector<128x1xf32>
      %c0_20 = arith.constant 0 : index
      %c0_21 = arith.constant 0 : index
      %19 = vector.load %arg10[%c0_20, %c0_21] : memref<128x128xf32, #tpu.memory_space<vmem>>, vector<128x128xf32>
      %20 = vector.broadcast %18 : vector<128x1xf32> to vector<128x128xf32>
      %21 = arith.mulf %20, %19 : vector<128x128xf32>
      %c0_22 = arith.constant 0 : index
      %c0_23 = arith.constant 0 : index
      %22 = vector.load %arg7[%c0_22, %c0_23] : memref<128x1xf32, #tpu.memory_space<vmem>>, vector<128x1xf32>
      %c0_24 = arith.constant 0 : index
      %c0_25 = arith.constant 0 : index
      %23 = vector.load %arg11[%c0_24, %c0_25] : memref<128x128xf32, #tpu.memory_space<vmem>>, vector<128x128xf32>
      %24 = vector.broadcast %22 : vector<128x1xf32> to vector<128x128xf32>
      %25 = arith.mulf %24, %23 : vector<128x128xf32>
      %26 = arith.addf %21, %25 : vector<128x128xf32>
      %c0_26 = arith.constant 0 : index
      %c0_27 = arith.constant 0 : index
      %27 = vector.load %arg8[%c0_26, %c0_27] : memref<1x128xf32, #tpu.memory_space<vmem>>, vector<1x128xf32>
      %28 = vector.broadcast %27 : vector<1x128xf32> to vector<128x128xf32>
      %29 = arith.addf %26, %28 : vector<128x128xf32>
      %c0_28 = arith.constant 0 : index
      %c0_29 = arith.constant 0 : index
      %30 = vector.load %arg9[%c0_28, %c0_29] : memref<128x128xf32, #tpu.memory_space<vmem>>, vector<128x128xf32>
      tpu.vector_store %arg9[%c0_28, %c0_29], %29 {strides = array<i32>} : memref<128x128xf32, #tpu.memory_space<vmem>>, vector<128x128xf32>,
    } else {
    }
    return
  }
  func.func @transform_0(%arg0: i32, %arg1: i32) -> (i32, i32) {
    %c0_i32 = arith.constant 0 : i32
    return %arg0, %arg1 : i32, i32
  }
  func.func @transform_1(%arg0: i32, %arg1: i32) -> (i32, i32) {
    %c0_i32 = arith.constant 0 : i32
    return %arg1, %arg0 : i32, i32
  }
  func.func @transform_2(%arg0: i32, %arg1: i32) -> (i32, i32) {
    %c0_i32 = arith.constant 0 : i32
    %c0_i32_0 = arith.constant 0 : i32
    return %arg1, %c0_i32 : i32, i32
  }
  func.func @transform_3(%arg0: i32, %arg1: i32) -> (i32, i32) {
    %c0_i32 = arith.constant 0 : i32
    %c0_i32_0 = arith.constant 0 : i32
    return %arg1, %c0_i32 : i32, i32
  }
  func.func @transform_4(%arg0: i32, %arg1: i32) -> (i32, i32) {
    %c0_i32 = arith.constant 0 : i32
    %c0_i32_0 = arith.constant 0 : i32
    return %arg0, %c0_i32 : i32, i32
  }
  func.func @transform_5(%arg0: i32, %arg1: i32) -> (i32, i32) {
    %c0_i32 = arith.constant 0 : i32
    %c0_i32_0 = arith.constant 0 : i32
    return %arg0, %c0_i32 : i32, i32
  }
  func.func @transform_6(%arg0: i32, %arg1: i32) -> (i32, i32) {
    %c0_i32 = arith.constant 0 : i32
    %c0_i32_0 = arith.constant 0 : i32
    %c0_i32_1 = arith.constant 0 : i32
    return %c0_i32, %c0_i32_0 : i32, i32
  }
  func.func @transform_7(%arg0: i32, %arg1: i32) -> (i32, i32) {
    %c0_i32 = arith.constant 0 : i32
    %c0_i32_0 = arith.constant 0 : i32
    return %arg0, %c0_i32 : i32, i32
  }
}

</mosaic_0001>

<bundles_post_ra>
// kernel: tpu_custom_call.1
= control target key start
LH: loop header
LB: loop body
LE: loop exit
PB: predicated region body
PF: predicated region fallthrough
CT: control target
= control target key end

     0   :  { %s2846_s0 = inlined_call_operand.vmem [shape: f32[256,256], index: 0, kind: input, shape index: {}]   ;;  %s2847_s1 = inlined_call_operand.hbm [shape: f32[256,256], index: 1, kind: input, shape index: {}]   ;;  %s2848_s2 = inlined_call_operand.hbm [shape: f32[256,128], index: 2, kind: input, shape index: {}]   ;;  %s2849_s3 = inlined_call_operand.hbm [shape: f32[256,128], index: 3, kind: input, shape index: {}]   ;;  %s2850_s4 = inlined_call_operand.vmem [shape: f32[256,1], index: 4, kind: input, shape index: {}]   ;;  %s2851_s5 = inlined_call_operand.vmem [shape: f32[256,1], index: 5, kind: input, shape index: {}]   ;;  %s2852_s6 = inlined_call_operand.vmem [shape: f32[1,128], index: 6, kind: input, shape index: {}]   ;;  %s2853_s7 = inlined_call_operand.hbm [shape: f32[256,128], index: 7, kind: output, shape index: {}]  }
   0x1   :  { %2873 = sst [smem:[#allocation31_spill]] %s2846_s0 }
   0x2   :  { %2874 = sst [smem:[#allocation32_spill]] %s2848_s2 }
   0x3   :  { %2875 = sst [smem:[#allocation33_spill]] %s2850_s4 }
   0x4   :  { %2876 = sst [smem:[#allocation34_spill]] %s2851_s5 }
   0x5   :  { %2877 = sst [smem:[#allocation35_spill]] %s2852_s6 }
   0x6   :  { %2878 = sst [smem:[#allocation36_spill]] %s2853_s7 }
   0x7   :  { %12 = vsyncpa [#allocation6], 0 }
   0x8   :  { %14 = vsyncpa [#allocation6 + $0x1], 0 }
   0x9   :  { %15 = vsyncpa [#allocation9], 0 }
   0xa   :  { %17 = vsyncpa [#allocation9 + $0x1], 0 }
   0xb   :  { %18 = vsyncpa [#allocation7], 0 }
   0xc   :  { %20 = vsyncpa [#allocation7 + $0x1], 0  ;;  %s2280_s24 = smov 0   ;;  %s2282_s25 = smov 0  }
   0xd   :  { %s2284_s26 = smov 0   ;;  %s2286_s27 = smov 0  }
   0xe   :  { %s2288_s28 = smov 0   ;;  %s2290_s29 = smov 0  }
   0xf   :  { %s2292_s30 = smov 0   ;;  %s2294_s8 = smov 0  }
  0x10   :  { %s2296_s9 = smov 0   ;;  %s2298_s10 = smov 0  }
  0x11   :  { %s2300_s11 = smov 0   ;;  %s2302_s12 = smov 0  }
  0x12   :  { %s2304_s13 = smov 0   ;;  %s2306_s14 = smov 0  }
  0x13 LB: > { %2879 = sst [smem:[#allocation15_spill]] %s2175_s24  ;;  %s2349_s15 = sadd.s32 4294967295, %s2227_s14   ;;  %s2227_s14 = sphi %s2306_s14, %s26_s14   ;;  %s2223_s13 = sphi %s2304_s13, %s2941_s13   ;;  %s2219_s12 = sphi %s2302_s12, %s2940_s12   ;;  %s2215_s11 = sphi %s2300_s11, %s2939_s11   ;;  %s2211_s10 = sphi %s2298_s10, %s2938_s10   ;;  %s2207_s9 = sphi %s2296_s9, %s2937_s9   ;;  %s2203_s8 = sphi %s2294_s8, %s2936_s8   ;;  %s2199_s30 = sphi %s2292_s30, %s2935_s30   ;;  %s2195_s29 = sphi %s2290_s29, %s2931_s29   ;;  %s2191_s28 = sphi %s2288_s28, %s2930_s28   ;;  %s2187_s27 = sphi %s2286_s27, %s2929_s27   ;;  %s2183_s26 = sphi %s2284_s26, %s2928_s26   ;;  %s2179_s25 = sphi %s2282_s25, %s2927_s25   ;;  %s2175_s24 = sphi %s2280_s24, %s2926_s24  }
  0x14   : > { %2880 = sst [smem:[#allocation16_spill]] %s2179_s25  ;;  %s35_s17 = sadd.s32 1, %s2219_s12 }
  0x15   : > { %2881 = sst [smem:[#allocation17_spill]] %s2183_s26  ;;  %s38_s18 = sadd.s32 1, %s2223_s13 }
  0x16   : > { %2882 = sst [smem:[#allocation18_spill]] %s2191_s28  ;;  %p36_p0 = scmp.ge.s32.totalorder %s35_s17, 2 }
  0x17   : > { %2883 = sst [smem:[#allocation19_spill]] %s2195_s29  ;;  %s47_s19 = sadd.s32 1, %s2207_s9 }
  0x18   : > { %2884 = sst [smem:[#allocation20_spill]] %s2211_s10  ;;  %p54_p1 = scmp.ne.s32.totalorder %s2207_s9, %s2203_s8 }
  0x19   : > { %2885 = sst [smem:[#allocation21_spill]] %s2215_s11  ;;  %p55_p2 = scmp.eq.s32.totalorder %s2227_s14, 0 }
  0x1a   : > { %2886 = sst [smem:[#allocation22_spill]] %s2349_s15  ;;  %s2943_s17 = smov (%p36_p0, %s35_s17), 0 }
  0x1b   : > { %2887 = sst [smem:[#allocation23_spill]] %s2943_s17  ;;  %s2945_s18 = smov (!%p36_p0, %s38_s18), %s2223_s13 }
  0x1c   : > { %s43_s20 = ssub.s32 %s2219_s12, %s2943_s17  ;;  %p2365_p3 = por %p55_p2, %p54_p1 }
  0x1d   : > { %p40_p4 = scmp.ge.s32.totalorder %s2945_s18, 2  ;;  %p88_p5 = scmp.ne.s32.totalorder %s2203_s8, %s2199_s30 }
  0x1e   : > { %p89_p6 = scmp.eq.s32.totalorder %s2349_s15, 0  ;;  %p99_p7 = scmp.eq.s32.totalorder %s43_s20, 0 }
  0x1f   : > { %s2947_s18 = smov (%p40_p4, %s2945_s18), 0  ;;  %s101_s23 = sadd.s32 1, %s2195_s29 }
  0x20   : > { %2889 = sst [smem:[#allocation24_spill]] %s2947_s18  ;;  %p2375_p8 = por %p89_p6, %p88_p5 }
  0x21   : > { %s42_s30 = ssub.s32 %s2223_s13, %s2947_s18  ;;  %p108_p9 = scmp.ne.s32.totalorder %s2195_s29, %s2191_s28 }
  0x22   : > { %s2890_s22 = scalar_select %p2375_p8, 1, 0 }
  0x23   : > { %s44_s16 = sor.u32 %s43_s20, %s42_s30  ;;  %p114_p10 = scmp.ne.s32.totalorder %s2191_s28, %s2187_s27 }
  0x24   : > { %p45_p11 = scmp.eq.s32.totalorder %s44_s16, 0  ;;  %p2388_p12 = por %p108_p9, %p55_p2 }
  0x25   : > { %s2393_s7 = scalar_select %p99_p7, %s2195_s29, %s101_s23  }
  0x26   : > { %s2396_s6 = scalar_select %p45_p11, %s2207_s9, %s47_s19  }
  0x27   : > { %2892 = sst [smem:[#allocation25_spill]] %s2393_s7  ;;  %p2400_p13 = por %p114_p10, %p89_p6 }
  0x28   : > { %2893 = sst [smem:[#allocation26_spill]] %s2396_s6  ;;  %p224_p0 = scmp.eq.s32.totalorder %s42_s30, 0 }
  0x29   : > { %s2894_s10 = scalar_select %p2400_p13, 1, 0 }
  0x2a   : > { %s226_s18 = sadd.s32 1, %s2183_s26  ;;  %p236_p1 = scmp.ne.s32.totalorder %s2183_s26, %s2179_s25 }
  0x2b   : > { %2895 = sst [smem:[#allocation27_spill]] %s2894_s10  ;;  %p237_p4 = scmp.eq.s32.totalorder %s2349_s15, 3 }
  0x2c   : > { %s2408_s20 = scalar_select %p224_p0, %s2183_s26, %s226_s18  }
  0x2d   : > { %p242_p5 = scmp.ne.s32.totalorder %s2179_s25, %s2175_s24  ;;  %s2897_s27 = sadd.s32 4294967294, %s2227_s14  }
  0x2e   : > { %2896 = sst [smem:[#allocation28_spill]] %s2408_s20  ;;  %p243_p2 = scmp.eq.s32.totalorder %s2897_s27, 3 }
  0x2f   : > { %p2415_p9 = por %p237_p4, %p236_p1  ;;  %p1581_p6 = scmp.ge.s32.totalorder %s2227_s14, 4 }
  0x30   : > { %p2419_p7 = por %p243_p2, %p242_p5 }
  0x31   : > { %s2898_s16 = scalar_select %p2415_p9, 1, 0 }
  0x32   : > { %s2900_s19 = scalar_select %p2419_p7, 1, 0 }
  0x33   : > { %2899 = sst [smem:[#allocation29_spill]] %s2898_s16  ;;  %262 = sbr.rel (%p1581_p6) target bundleno = 157 (0x9d), region = 20 }
  0x34   : > { %2901 = sst [smem:[#allocation30_spill]] %s2900_s19 }
  0x3a   : > { %265 = sbr.rel (!%p2365_p3) target bundleno = 76 (0x4c), region = 24  ;;  %s267_s18 = sand.u32 (%p2365_p3), 1, %s2207_s9  }
  0x3b   : > { %s1614_s23 = sshll.u32 (%p2365_p3), %s2223_s13, 5  ;;  %s1582_s30 = sshll.u32 (%p2365_p3), %s267_s18, 7 }
  0x3c   : > { %s272_s27 = sadd.s32 (%p2365_p3), %s2219_s12, %s1614_s23  ;;  %s2902_s0 = sld [smem:[#allocation31_spill]] (%p2365_p3) }
  0x3d   : > { %s1585_s6 = sshll.u32 (%p2365_p3), %s272_s27, 3  ;;  %s269_s18 = scalar_lea.vmem (%p2365_p3), [#allocation4], %s1582_s30 }
  0x42   : > { %s2432_s26 = scalar_lea.vmem %s2902_s0, %s1585_s6 }
  0x43   : > { %v332_v0 = vld [vmem:[%s2432_s26] sm:$0xff]  ;;  %v334_v1 = vld [vmem:[%s2432_s26 + $0x10] sm:$0xff] }
  0x44   : > { %v336_v2 = vld [vmem:[%s2432_s26 + $0x20] sm:$0xff]  ;;  %333 = vst [vmem:[%s269_s18] sm:$0xff] %v332_v0  ;;  %335 = vst [vmem:[%s269_s18 + $0x8] sm:$0xff] %v334_v1  ;;  %v338_v3 = vld [vmem:[%s2432_s26 + $0x30] sm:$0xff] }
  0x45   : > { %337 = vst [vmem:[%s269_s18 + $0x10] sm:$0xff] %v336_v2  ;;  %v340_v4 = vld [vmem:[%s2432_s26 + $0x40] sm:$0xff]  ;;  %v342_v5 = vld [vmem:[%s2432_s26 + $0x50] sm:$0xff]  ;;  %339 = vst [vmem:[%s269_s18 + $0x18] sm:$0xff] %v338_v3 }
  0x46   : > { %341 = vst [vmem:[%s269_s18 + $0x20] sm:$0xff] %v340_v4  ;;  %343 = vst [vmem:[%s269_s18 + $0x28] sm:$0xff] %v342_v5  ;;  %v344_v6 = vld [vmem:[%s2432_s26 + $0x60] sm:$0xff]  ;;  %v346_v7 = vld [vmem:[%s2432_s26 + $0x70] sm:$0xff] }
  0x47   : > { %v348_v8 = vld [vmem:[%s2432_s26 + $0x80] sm:$0xff]  ;;  %345 = vst [vmem:[%s269_s18 + $0x30] sm:$0xff] %v344_v6  ;;  %347 = vst [vmem:[%s269_s18 + $0x38] sm:$0xff] %v346_v7  ;;  %v350_v9 = vld [vmem:[%s2432_s26 + $0x90] sm:$0xff] }
  0x48   : > { %349 = vst [vmem:[%s269_s18 + $0x40] sm:$0xff] %v348_v8  ;;  %v352_v10 = vld [vmem:[%s2432_s26 + $0xa0] sm:$0xff]  ;;  %v354_v11 = vld [vmem:[%s2432_s26 + $0xb0] sm:$0xff]  ;;  %351 = vst [vmem:[%s269_s18 + $0x48] sm:$0xff] %v350_v9 }
  0x49   : > { %353 = vst [vmem:[%s269_s18 + $0x50] sm:$0xff] %v352_v10  ;;  %355 = vst [vmem:[%s269_s18 + $0x58] sm:$0xff] %v354_v11  ;;  %v356_v12 = vld [vmem:[%s2432_s26 + $0xc0] sm:$0xff]  ;;  %v358_v13 = vld [vmem:[%s2432_s26 + $0xd0] sm:$0xff] }
  0x4a   : > { %v360_v14 = vld [vmem:[%s2432_s26 + $0xe0] sm:$0xff]  ;;  %357 = vst [vmem:[%s269_s18 + $0x60] sm:$0xff] %v356_v12  ;;  %359 = vst [vmem:[%s269_s18 + $0x68] sm:$0xff] %v358_v13  ;;  %v362_v15 = vld [vmem:[%s2432_s26 + $0xf0] sm:$0xff] }
  0x4b   : > { %361 = vst [vmem:[%s269_s18 + $0x70] sm:$0xff] %v360_v14  ;;  %363 = vst [vmem:[%s269_s18 + $0x78] sm:$0xff] %v362_v15 }
  0x4c PF: > { %s393_s6 = sand.u32 1, %s2227_s14   ;;  %s395_s7 = sand.u32 1, %s2195_s29  }
  0x4d   : > { %s2452_s20 = sshll.u32 %s395_s7, 7  ;;  %s2861_s23 = sshll.u32 %s2219_s12, 11 }
  0x4e   : > { %s2903_s2 = sld [smem:[#allocation32_spill]]  ;;  %s397_s26 = scalar_lea.vmem [#allocation8], %s2452_s20 }
  0x4f   : > { %s404_s18 = sshll.u32 %s397_s26, 4  ;;  %s2465_s19 = scalar_lea.sflag [#allocation9], %s393_s6  ;;  %s2463_s18 = int_to_ptr.vmem [resolvable:$true] %s404_s18 }
  0x54   : > { %s2460_s0 = scalar_lea.hbm %s2903_s2, %s2861_s23  ;;  %s1997_s30 = scalar_lea.hbm %s2903_s2, 4096 }
  0x55   : > { %s1993_s7 = scalar_lea.hbm %s2460_s0, 2048  ;;  %p1998_p1 = scmp.lt.u32.totalorder %s2460_s0, %s2903_s2 }
  0x56   : > { %p1994_p10 = scmp.ne.s32.totalorder %s2460_s0, %s1993_s7  ;;  %p1999_p4 = scmp.lt.u32.totalorder %s1997_s30, %s1993_s7 }
  0x57   : > { %p2001_p2 = scmp.lt.u32.totalorder %s1993_s7, %s2460_s0 }
  0x58   : > { %p1995_p11 = pnand %p1994_p10, %p2388_p12  ;;  %p2000_p5 = por %p1999_p4, %p1998_p1 }
  0x5a   : > { %p1996_p0 = pneg %p1995_p11  ;;  %p2002_p6 = por %p2001_p2, %p2000_p5 }
  0x5c   : > { %p2003_p7 = pnand %p2002_p6, %p1996_p0 }
  0x5e   : > { %2006 = shalt.err (!%p2003_p7)
}
  0x5f   : > { %s2007_s6 = scalar_lea.vmem %s2463_s18, 2048  ;;  %s2229_s24 = smov [#allocation8]  }
  0x60   : > { %p2008_p10 = scmp.ne.s32.totalorder %s2463_s18, %s2007_s6  ;;  %s2011_s29 = sshll.u32 %s2229_s24, 4  ;;  %s2012_s29 = int_to_ptr.vmem [resolvable:$false] %s2011_s29 }
  0x61   : > { %s2013_s23 = scalar_lea.vmem %s2012_s29, 4096  ;;  %p2014_p13 = scmp.lt.s32.totalorder %s2463_s18, %s2012_s29 }
  0x62   : > { %p2009_p11 = pnand %p2008_p10, %p2388_p12  ;;  %p2015_p8 = scmp.lt.s32.totalorder %s2013_s23, %s2007_s6 }
  0x64   : > { %p2010_p9 = pneg %p2009_p11  ;;  %p2016_p1 = por %p2015_p8, %p2014_p13 }
  0x66   : > { %p2017_p4 = pnand %p2016_p1, %p2010_p9 }
  0x68   : > { %2020 = shalt.err (!%p2017_p4)
}
  0x69   : > { %s2230_s26 = smov 128   ;;  %s2231_s7 = smov 8  }
  0x6a   : > { %1860 = dma.hbm_to_vmem [thread:$0]  (%p2388_p12), %s2460_s0, 2048, %s2463_s18, %s2465_s19, %s2230_s26, %s2230_s26, %s2231_s7  }
  0x6b   : > { %s2904_s30 = sshll.u32 %s2219_s12, 11  ;;  %s418_s29 = scalar_lea.vmem [#allocation10], %s2452_s20 }
  0x6c   : > { %s2497_s24 = scalar_lea.hbm %s2849_s3, %s2904_s30  ;;  %s425_s23 = sshll.u32 %s418_s29, 4  ;;  %s2510_s23 = int_to_ptr.vmem [resolvable:$true] %s425_s23 }
  0x6d   : > { %s370_s2 = sand.u32 1, %s2207_s9   ;;  %s1615_s16 = sshll.u32 %s2219_s12, 5 }
  0x6e   : > { %s1586_s5 = sshll.u32 %s370_s2, 7  ;;  %s380_s4 = sadd.s32 %s2223_s13, %s1615_s16 }
  0x6f   : > { %s1589_s11 = sshll.u32 %s380_s4, 7  ;;  %s374_s25 = scalar_lea.vmem [#allocation5], %s1586_s5 }
  0x70   : > { %s383_s10 = sshll.u32 %s374_s25, 4  ;;  %s2506_s0 = scalar_lea.hbm %s2847_s1, %s1589_s11  ;;  %s2508_s10 = int_to_ptr.vmem [resolvable:$true] %s383_s10 }
  0x71   : > { %s2512_s20 = scalar_lea.sflag [#allocation6], %s370_s2  ;;  %s2021_s18 = scalar_lea.hbm %s2506_s0, 2048 }
  0x72   : > { %p2022_p8 = scmp.ne.s32.totalorder %s2506_s0, %s2021_s18  ;;  %s2025_s25 = scalar_lea.hbm %s2847_s1, 8192 }
  0x73   : > { %p2026_p7 = scmp.lt.u32.totalorder %s2506_s0, %s2847_s1  ;;  %p2027_p0 = scmp.lt.u32.totalorder %s2025_s25, %s2021_s18 }
  0x74   : > { %p2023_p13 = pnand %p2022_p8, %p2365_p3  ;;  %p2029_p2 = scmp.lt.u32.totalorder %s2021_s18, %s2506_s0 }
  0x75   : > { %p2028_p5 = por %p2027_p0, %p2026_p7 }
  0x76   : > { %p2024_p9 = pneg %p2023_p13 }
  0x77   : > { %p2030_p6 = por %p2029_p2, %p2028_p5 }
  0x79   : > { %p2031_p10 = pnand %p2030_p6, %p2024_p9 }
  0x7b   : > { %2034 = shalt.err (!%p2031_p10)
}
  0x7c   : > { %s2035_s2 = scalar_lea.vmem %s2508_s10, 2048  ;;  %s2232_s15 = smov [#allocation5]  }
  0x7d   : > { %p2036_p11 = scmp.ne.s32.totalorder %s2508_s10, %s2035_s2  ;;  %s2039_s16 = sshll.u32 %s2232_s15, 4  ;;  %s2040_s16 = int_to_ptr.vmem [resolvable:$false] %s2039_s16 }
  0x7e   : > { %s2041_s30 = scalar_lea.vmem %s2040_s16, 4096  ;;  %p2042_p8 = scmp.lt.s32.totalorder %s2508_s10, %s2040_s16 }
  0x7f   : > { %p2037_p1 = pnand %p2036_p11, %p2365_p3  ;;  %p2043_p13 = scmp.lt.s32.totalorder %s2041_s30, %s2035_s2 }
  0x81   : > { %p2038_p4 = pneg %p2037_p1  ;;  %p2044_p7 = por %p2043_p13, %p2042_p8 }
  0x83   : > { %p2045_p0 = pnand %p2044_p7, %p2038_p4 }
  0x85   : > { %2048 = shalt.err (!%p2045_p0)
}
  0x86   : > { %s2233_s27 = smov 256   ;;  %s2049_s6 = scalar_lea.hbm %s2497_s24, 2048 }
  0x87   : > { %1859 = dma.hbm_to_vmem [thread:$0]  (%p2365_p3), %s2506_s0, 2048, %s2508_s10, %s2512_s20, %s2233_s27, %s2230_s26, %s2231_s7  }
  0x88   : > { %p2050_p9 = scmp.ne.s32.totalorder %s2497_s24, %s2049_s6  ;;  %s2053_s21 = scalar_lea.hbm %s2849_s3, 4096 }
  0x89   : > { %p2054_p6 = scmp.lt.u32.totalorder %s2497_s24, %s2849_s3  ;;  %p2055_p10 = scmp.lt.u32.totalorder %s2053_s21, %s2049_s6 }
  0x8a   : > { %p2051_p5 = pnand %p2050_p9, %p2388_p12  ;;  %p2057_p1 = scmp.lt.u32.totalorder %s2049_s6, %s2497_s24 }
  0x8b   : > { %p2056_p11 = por %p2055_p10, %p2054_p6 }
  0x8c   : > { %p2052_p2 = pneg %p2051_p5 }
  0x8d   : > { %p2058_p4 = por %p2057_p1, %p2056_p11 }
  0x8f   : > { %p2059_p8 = pnand %p2058_p4, %p2052_p2 }
  0x91   : > { %2062 = shalt.err (!%p2059_p8)
}
  0x92   : > { %s2063_s10 = scalar_lea.vmem %s2510_s23, 2048  ;;  %s2234_s0 = smov [#allocation10]  }
  0x93   : > { %p2064_p3 = scmp.ne.s32.totalorder %s2510_s23, %s2063_s10  ;;  %s2067_s20 = sshll.u32 %s2234_s0, 4  ;;  %s2068_s20 = int_to_ptr.vmem [resolvable:$false] %s2067_s20 }
  0x94   : > { %s2069_s25 = scalar_lea.vmem %s2068_s20, 4096  ;;  %p2070_p0 = scmp.lt.s32.totalorder %s2510_s23, %s2068_s20 }
  0x95   : > { %p2065_p13 = pnand %p2064_p3, %p2388_p12  ;;  %p2071_p9 = scmp.lt.s32.totalorder %s2069_s25, %s2063_s10 }
  0x97   : > { %p2066_p7 = pneg %p2065_p13  ;;  %p2072_p5 = por %p2071_p9, %p2070_p0 }
  0x99   : > { %p2073_p6 = pnand %p2072_p5, %p2066_p7 }
  0x9b   : > { %2076 = shalt.err (!%p2073_p6)
}
  0x9c   : > { %1861 = dma.hbm_to_vmem [thread:$0]  (%p2388_p12), %s2497_s24, 2048, %s2510_s23, %s2465_s19, %s2230_s26, %s2230_s26, %s2231_s7  }
  0x9d PF: > { %p1596_p2 = scmp.ge.s32.totalorder %s2227_s14, 1  ;;  %p451_p10 = scmp.lt.s32.totalorder %s2227_s14, 5 }
  0x9f   : > { %p452_p11 = pnand %p1596_p2, %p451_p10 }
  0xa0   : > { %s458_s28 = sand.u32 (!%p452_p11), 1, %s2203_s8   ;;  %p2905_p1 = scmp.ne.s32.totalorder (!%p452_p11), %s2890_s22, 0 }
  0xa1   : > { %455 = sbr.rel (%p452_p11) target bundleno = 748 (0x2ec), region = 82  ;;  %s1597_s11 = sshll.u32 (!%p452_p11), %s458_s28, 7 }
  0xa2   : > { %s2566_s2 = scalar_lea.vmem (!%p452_p11), [#allocation4], %s1597_s11  ;;  %s465_s17 = scalar_lea.sflag (!%p452_p11), [#allocation6], %s458_s28 }
  0xa3   : > { %s2568_s15 = scalar_lea.vmem (!%p452_p11), [#allocation5], %s1597_s11 }
  0xa8   : > { %2162 = dma.done.wait (%p2905_p1), %s465_s17, 2048  }
  0xa9   : > { %2164 = vsyncadd (%p2905_p1), %s465_s17, 4294965248  ;;  %s2906_s19 = sld [smem:[#allocation22_spill]]  ;;  %s2907_s26 = sld [smem:[#allocation18_spill]] }
  0xaa   : > { %s2908_s7 = sld [smem:[#allocation27_spill]] }
  0xaf   : > { %s473_s24 = sand.u32 1, %s2906_s19   ;;  %s475_s23 = sand.u32 1, %s2907_s26  }
  0xb0   : > { %s1599_s16 = sshll.u32 %s475_s23, 7  ;;  %s474_s30 = scalar_lea.sflag [#allocation9], %s473_s24 }
  0xb1   : > { %s2576_s27 = scalar_lea.vmem [#allocation8], %s1599_s16  ;;  %p2909_p12 = scmp.ne.s32.totalorder %s2908_s7, 0 }
  0xb3   : > { %2166 = dma.done.wait (%p2909_p12), %s474_s30, 4096  }
  0xb4   : > { %2168 = vsyncadd (%p2909_p12), %s474_s30, 4294963200  ;;  %s2910_s6 = sld [smem:[#allocation16_spill]]  ;;  %s2911_s29 = sld [smem:[#allocation21_spill]] }
  0xb5   : > { %s2912_s0 = sld [smem:[#allocation33_spill]]  ;;  %s2913_s11 = sld [smem:[#allocation34_spill]] }
  0xb6   : > { %s2596_s19 = scalar_lea.vmem [#allocation10], %s1599_s16  ;;  %s2914_s7 = sld [smem:[#allocation20_spill]] }
  0xba   : > { %s538_s18 = sand.u32 1, %s2910_s6   ;;  %s1602_s21 = sshll.u32 %s2911_s29, 4 }
  0xbb   : > { %s1601_s22 = sshll.u32 %s538_s18, 7  ;;  %p546_p4 = scmp.lt.s32.totalorder %s1602_s21, 31 }
  0xbc   : > { %s2598_s26 = scalar_lea.vmem [#allocation11], %s1601_s22  ;;  %p1606_p8 = scmp.ne.s32.totalorder %s2914_s7, 0 }
  0xbd   : > { %s2949_s21 = smov (!%p546_p4, %s1602_s21), 31  ;;  %v2235_v16 = vmov (!%p1606_p8), 0.0  }
  0xbe   : > { %s1603_s4 = sshll.u32 %s2949_s21, 3  ;;  %561 = sbr.rel (%p1606_p8) target bundleno = 206 (0xce), region = 102  ;;  %562 = vst [vmem:[#allocation2] sm:$0xff] (!%p1606_p8), %v2235_v16  ;;  %563 = vst [vmem:[#allocation2 + $0x8] sm:$0xff] (!%p1606_p8), %v2235_v16 }
  0xbf   : > { %s2589_s20 = scalar_lea.vmem %s2912_s0, %s1603_s4  ;;  %s2594_s17 = scalar_lea.vmem %s2913_s11, %s1603_s4  ;;  %564 = vst [vmem:[#allocation2 + $0x10] sm:$0xff] (!%p1606_p8), %v2235_v16  ;;  %565 = vst [vmem:[#allocation2 + $0x18] sm:$0xff] (!%p1606_p8), %v2235_v16 }
  0xc0   : > { %566 = vst [vmem:[#allocation2 + $0x20] sm:$0xff] (!%p1606_p8), %v2235_v16  ;;  %567 = vst [vmem:[#allocation2 + $0x28] sm:$0xff] (!%p1606_p8), %v2235_v16 }
  0xc1   : > { %568 = vst [vmem:[#allocation2 + $0x30] sm:$0xff] (!%p1606_p8), %v2235_v16  ;;  %569 = vst [vmem:[#allocation2 + $0x38] sm:$0xff] (!%p1606_p8), %v2235_v16 }
  0xc2   : > { %570 = vst [vmem:[#allocation2 + $0x40] sm:$0xff] (!%p1606_p8), %v2235_v16  ;;  %571 = vst [vmem:[#allocation2 + $0x48] sm:$0xff] (!%p1606_p8), %v2235_v16 }
  0xc3   : > { %572 = vst [vmem:[#allocation2 + $0x50] sm:$0xff] (!%p1606_p8), %v2235_v16  ;;  %573 = vst [vmem:[#allocation2 + $0x58] sm:$0xff] (!%p1606_p8), %v2235_v16 }
  0xc4   : > { %574 = vst [vmem:[#allocation2 + $0x60] sm:$0xff] (!%p1606_p8), %v2235_v16  ;;  %575 = vst [vmem:[#allocation2 + $0x68] sm:$0xff] (!%p1606_p8), %v2235_v16 }
  0xc5   : > { %576 = vst [vmem:[#allocation2 + $0x70] sm:$0xff] %v2235_v16  ;;  %577 = vst [vmem:[#allocation2 + $0x78] sm:$0xff] %v2235_v16 }
  0xc6   : > { %578 = vst [vmem:[#allocation3] sm:$0xff] %v2235_v16  ;;  %579 = vst [vmem:[#allocation3 + $0x8] sm:$0xff] %v2235_v16 }
  0xc7   : > { %580 = vst [vmem:[#allocation3 + $0x10] sm:$0xff] %v2235_v16  ;;  %581 = vst [vmem:[#allocation3 + $0x18] sm:$0xff] %v2235_v16 }
  0xc8   : > { %582 = vst [vmem:[#allocation3 + $0x20] sm:$0xff] %v2235_v16  ;;  %583 = vst [vmem:[#allocation3 + $0x28] sm:$0xff] %v2235_v16 }
  0xc9   : > { %584 = vst [vmem:[#allocation3 + $0x30] sm:$0xff] %v2235_v16  ;;  %585 = vst [vmem:[#allocation3 + $0x38] sm:$0xff] %v2235_v16 }
  0xca   : > { %586 = vst [vmem:[#allocation3 + $0x40] sm:$0xff] %v2235_v16  ;;  %587 = vst [vmem:[#allocation3 + $0x48] sm:$0xff] %v2235_v16 }
  0xcb   : > { %588 = vst [vmem:[#allocation3 + $0x50] sm:$0xff] %v2235_v16  ;;  %589 = vst [vmem:[#allocation3 + $0x58] sm:$0xff] %v2235_v16 }
  0xcc   : > { %590 = vst [vmem:[#allocation3 + $0x60] sm:$0xff] %v2235_v16  ;;  %591 = vst [vmem:[#allocation3 + $0x68] sm:$0xff] %v2235_v16 }
  0xcd   : > { %592 = vst [vmem:[#allocation3 + $0x70] sm:$0xff] %v2235_v16  ;;  %593 = vst [vmem:[#allocation3 + $0x78] sm:$0xff] %v2235_v16 }
  0xce PF: > { %v835_v17 = vld [vmem:[%s2568_s15] sm:$0xff]  ;;  %v836_v18 = vld [vmem:[%s2568_s15 + $0x8] sm:$0xff]  ;;  %v837_v21 = vld [vmem:[%s2568_s15 + $0x10] sm:$0xff] }
  0xcf   : > { %867 = vxpose.xlu0.b32.start [1/16] %v835_v17, 128  ;;  %v851_v19 = vld [vmem:[%s2596_s19] sm:$0xff]  ;;  %v852_v20 = vld [vmem:[%s2596_s19 + $0x8] sm:$0xff]  ;;  %v853_v23 = vld [vmem:[%s2596_s19 + $0x10] sm:$0xff] }
  0xd0   : > { %v1827_v22 = vpack.c.bf16 %v852_v20, %v851_v19  ;;  %v854_v24 = vld [vmem:[%s2596_s19 + $0x18] sm:$0xff]  ;;  %v855_v26 = vld [vmem:[%s2596_s19 + $0x20] sm:$0xff]  ;;  %v856_v27 = vld [vmem:[%s2596_s19 + $0x28] sm:$0xff] }
  0xd1   : > { %v1831_v25 = vpack.c.bf16 %v854_v24, %v853_v23  ;;  %v838_v28 = vld [vmem:[%s2568_s15 + $0x18] sm:$0xff]  ;;  %v1835_v29 = vpack.c.bf16 %v856_v27, %v855_v26  ;;  %v857_v30 = vld [vmem:[%s2596_s19 + $0x30] sm:$0xff]  ;;  %v626_v31 = vld [vmem:[%s2576_s27] sm:$0xff] }
  0xd2   : > { %1828 = vmatprep.subr.bf16.mxu1 %v1827_v22  ;;  %v627_v32 = vld [vmem:[%s2576_s27 + $0x8] sm:$0xff]  ;;  %v858_v33 = vld [vmem:[%s2596_s19 + $0x38] sm:$0xff]  ;;  %v628_v35 = vld [vmem:[%s2576_s27 + $0x10] sm:$0xff] }
  0xd3   : > { %868 = vxpose.xlu0.b32.cont [2/16] %v836_v18, 128  ;;  %1830 = vmatpush3.bf16.msra.mxu1 %v1827_v22  ;;  %v1795_v34 = vpack.c.bf16 %v627_v32, %v626_v31  ;;  %v629_v36 = vld [vmem:[%s2576_s27 + $0x18] sm:$0xff]  ;;  %v630_v38 = vld [vmem:[%s2576_s27 + $0x20] sm:$0xff]  ;;  %v631_v39 = vld [vmem:[%s2576_s27 + $0x28] sm:$0xff]  ;;  %v1839_v41 = vpack.c.bf16 %v858_v33, %v857_v30 }
  0xd4   : > { %1832 = vmatprep.subr.bf16.mxu1 %v1831_v25  ;;  %v1799_v37 = vpack.c.bf16 %v629_v36, %v628_v35  ;;  %v839_v40 = vld [vmem:[%s2568_s15 + $0x20] sm:$0xff]  ;;  %v860_v43 = vld [vmem:[%s2596_s19 + $0x48] sm:$0xff]  ;;  %v1803_v44 = vpack.c.bf16 %v631_v39, %v630_v38  ;;  %v632_v45 = vld [vmem:[%s2576_s27 + $0x30] sm:$0xff] }
  0xd5   : > { %1796 = vmatprep.subr.bf16.mxu0 %v1795_v34  ;;  %v859_v42 = vld [vmem:[%s2596_s19 + $0x40] sm:$0xff]  ;;  %v633_v46 = vld [vmem:[%s2576_s27 + $0x38] sm:$0xff]  ;;  %v840_v47 = vld [vmem:[%s2568_s15 + $0x28] sm:$0xff] }
  0xd6   : > { %1798 = vmatpush3.bf16.msra.mxu0 %v1795_v34  ;;  %v1843_v48 = vpack.c.bf16 %v860_v43, %v859_v42  ;;  %v861_v49 = vld [vmem:[%s2596_s19 + $0x50] sm:$0xff]  ;;  %v862_v50 = vld [vmem:[%s2596_s19 + $0x58] sm:$0xff]  ;;  %v1807_v51 = vpack.c.bf16 %v633_v46, %v632_v45  ;;  %v634_v52 = vld [vmem:[%s2576_s27 + $0x40] sm:$0xff] }
  0xd7   : > { %869 = vxpose.xlu0.b32.cont [3/16] %v837_v21, 128  ;;  %1834 = vmatpush3.bf16.msra.mxu1 %v1831_v25  ;;  %v635_v53 = vld [vmem:[%s2576_s27 + $0x48] sm:$0xff]  ;;  %v841_v54 = vld [vmem:[%s2568_s15 + $0x30] sm:$0xff]  ;;  %v1847_v55 = vpack.c.bf16 %v862_v50, %v861_v49  ;;  %v863_v56 = vld [vmem:[%s2596_s19 + $0x60] sm:$0xff] }
  0xd8   : > { %1836 = vmatprep.subr.bf16.mxu1 %v1835_v29  ;;  %1800 = vmatprep.subr.bf16.mxu0 %v1799_v37  ;;  %v864_v57 = vld [vmem:[%s2596_s19 + $0x68] sm:$0xff]  ;;  %v1811_v58 = vpack.c.bf16 %v635_v53, %v634_v52  ;;  %v636_v59 = vld [vmem:[%s2576_s27 + $0x50] sm:$0xff]  ;;  %v637_v60 = vld [vmem:[%s2576_s27 + $0x58] sm:$0xff] }
  0xd9   : > { %v842_v61 = vld [vmem:[%s2568_s15 + $0x38] sm:$0xff]  ;;  %v1851_v62 = vpack.c.bf16 %v864_v57, %v863_v56  ;;  %v865_v63 = vld [vmem:[%s2596_s19 + $0x70] sm:$0xff]  ;;  %v1815_v1 = vpack.c.bf16 %v637_v60, %v636_v59  ;;  %v638_v2 = vld [vmem:[%s2576_s27 + $0x60] sm:$0xff] }
  0xda   : > { %1802 = vmatpush3.bf16.msra.mxu0 %v1799_v37  ;;  %v866_v0 = vld [vmem:[%s2596_s19 + $0x78] sm:$0xff]  ;;  %v639_v3 = vld [vmem:[%s2576_s27 + $0x68] sm:$0xff]  ;;  %v843_v4 = vld [vmem:[%s2568_s15 + $0x40] sm:$0xff] }
  0xdb   : > { %870 = vxpose.xlu0.b32.cont [4/16] %v838_v28, 128  ;;  %1838 = vmatpush3.bf16.msra.mxu1 %v1835_v29  ;;  %v1855_v5 = vpack.c.bf16 %v866_v0, %v865_v63  ;;  %v610_v6 = vld [vmem:[%s2566_s2] sm:$0xff]  ;;  %v1819_v7 = vpack.c.bf16 %v639_v3, %v638_v2  ;;  %v640_v8 = vld [vmem:[%s2576_s27 + $0x70] sm:$0xff]  ;;  %v641_v9 = vld [vmem:[%s2576_s27 + $0x78] sm:$0xff] }
  0xdc   : > { %1840 = vmatprep.subr.bf16.mxu1 %v1839_v41  ;;  %1804 = vmatprep.subr.bf16.mxu0 %v1803_v44  ;;  %v844_v10 = vld [vmem:[%s2568_s15 + $0x48] sm:$0xff]  ;;  %v1823_v11 = vpack.c.bf16 %v641_v9, %v640_v8  ;;  %v845_v12 = vld [vmem:[%s2568_s15 + $0x50] sm:$0xff]  ;;  %v846_v13 = vld [vmem:[%s2568_s15 + $0x58] sm:$0xff] }
  0xdd   : > { %1715 = vmatprep.mubr.f32.mxu0 %v610_v6  ;;  %v611_v14 = vld [vmem:[%s2566_s2 + $0x8] sm:$0xff]  ;;  %v612_v15 = vld [vmem:[%s2566_s2 + $0x10] sm:$0xff]  ;;  %v847_v16 = vld [vmem:[%s2568_s15 + $0x60] sm:$0xff] }
  0xde   : > { %1806 = vmatpush3.bf16.msra.mxu0 %v1803_v44  ;;  %v613_v17 = vld [vmem:[%s2566_s2 + $0x18] sm:$0xff]  ;;  %v614_v18 = vld [vmem:[%s2566_s2 + $0x20] sm:$0xff]  ;;  %v848_v19 = vld [vmem:[%s2568_s15 + $0x68] sm:$0xff] }
  0xdf   : > { %871 = vxpose.xlu0.b32.cont [5/16] %v839_v40, 128  ;;  %1842 = vmatpush3.bf16.msra.mxu1 %v1839_v41  ;;  %v615_v20 = vld [vmem:[%s2566_s2 + $0x28] sm:$0xff]  ;;  %v616_v21 = vld [vmem:[%s2566_s2 + $0x30] sm:$0xff]  ;;  %v617_v23 = vld [vmem:[%s2566_s2 + $0x38] sm:$0xff] }
  0xe0   : > { %1844 = vmatprep.subr.bf16.mxu1 %v1843_v48  ;;  %1808 = vmatprep.subr.bf16.mxu0 %v1807_v51  ;;  %v849_v22 = vld [vmem:[%s2568_s15 + $0x70] sm:$0xff]  ;;  %v618_v24 = vld [vmem:[%s2566_s2 + $0x40] sm:$0xff]  ;;  %v850_v25 = vld [vmem:[%s2568_s15 + $0x78] sm:$0xff] }
  0xe1   : > { %v619_v26 = vld [vmem:[%s2566_s2 + $0x48] sm:$0xff]  ;;  %v620_v27 = vld [vmem:[%s2566_s2 + $0x50] sm:$0xff]  ;;  %v621_v28 = vld [vmem:[%s2566_s2 + $0x58] sm:$0xff] }
  0xe2   : > { %1810 = vmatpush3.bf16.msra.mxu0 %v1807_v51  ;;  %v622_v29 = vld [vmem:[%s2566_s2 + $0x60] sm:$0xff]  ;;  %v623_v30 = vld [vmem:[%s2566_s2 + $0x68] sm:$0xff]  ;;  %v624_v31 = vld [vmem:[%s2566_s2 + $0x70] sm:$0xff] }
  0xe3   : > { %872 = vxpose.xlu0.b32.cont [6/16] %v840_v47, 128  ;;  %1846 = vmatpush3.bf16.msra.mxu1 %v1843_v48  ;;  %v625_v32 = vld [vmem:[%s2566_s2 + $0x78] sm:$0xff]  ;;  %v595_v49 = vld [vmem:[#allocation2 + $0x8] sm:$0xff]  ;;  %v594_v50 = vld [vmem:[#allocation2] sm:$0xff]  ;;  %s2915_s2 = sld [smem:[#allocation20_spill]] }
  0xe4   : > { %1848 = vmatprep.subr.bf16.mxu1 %v1847_v55  ;;  %1812 = vmatprep.subr.bf16.mxu0 %v1811_v58  ;;  %v596_v56 = vld [vmem:[#allocation2 + $0x10] sm:$0xff]  ;;  %v601_v3 = vld [vmem:[#allocation2 + $0x38] sm:$0xff]  ;;  %v603_v9 = vld [vmem:[#allocation2 + $0x48] sm:$0xff] }
  0xe6   : > { %1814 = vmatpush3.bf16.msra.mxu0 %v1811_v58 }
  0xe7   : > { %873 = vxpose.xlu0.b32.cont [7/16] %v841_v54, 128  ;;  %1850 = vmatpush3.bf16.msra.mxu1 %v1847_v55  ;;  %v597_v55 = vld [vmem:[#allocation2 + $0x18] sm:$0xff] }
  0xe8   : > { %1852 = vmatprep.subr.bf16.mxu1 %v1851_v62  ;;  %1816 = vmatprep.subr.bf16.mxu0 %v1815_v1 }
  0xe9   : > { %p1607_p3 = scmp.ne.s32.totalorder %s2915_s2, 1 }
  0xea   : > { %1818 = vmatpush3.bf16.msra.mxu0 %v1815_v1  ;;  %s2916_s23 = sld [smem:[#allocation35_spill]] (!%p1607_p3) }
  0xeb   : > { %874 = vxpose.xlu0.b32.cont [8/16] %v842_v61, 128  ;;  %1854 = vmatpush3.bf16.msra.mxu1 %v1851_v62  ;;  %v599_v61 = vld [vmem:[#allocation2 + $0x28] sm:$0xff]  ;;  %v598_v62 = vld [vmem:[#allocation2 + $0x20] sm:$0xff] }
  0xec   : > { %1856 = vmatprep.subr.bf16.mxu1 %v1855_v5  ;;  %1820 = vmatprep.subr.bf16.mxu0 %v1819_v7 }
  0xee   : > { %1822 = vmatpush3.bf16.msra.mxu0 %v1819_v7 }
  0xef   : > { %875 = vxpose.xlu0.b32.cont [9/16] %v843_v4, 128  ;;  %1858 = vmatpush3.bf16.msra.mxu1 %v1855_v5  ;;  %v600_v4 = vld [vmem:[#allocation2 + $0x30] sm:$0xff] }
  0xf0   : > { %1824 = vmatprep.subr.bf16.mxu0 %v1823_v11 }
  0xf2   : > { %1826 = vmatpush3.bf16.msra.mxu0 %v1823_v11 }
  0xf3   : > { %876 = vxpose.xlu0.b32.cont [10/16] %v844_v10, 128  ;;  %v602_v10 = vld [vmem:[#allocation2 + $0x40] sm:$0xff] }
  0xf5   : > { %1716 = vmatmul.mubr.f32.vlgmr.msra.gmra.mrb[0].mxu0 %v611_v14 }
  0xf6   : > { %1718 = vmatprep.mubr.f32.mxu0 %v612_v15  ;;  %v605_v15 = vld [vmem:[#allocation2 + $0x58] sm:$0xff] }
  0xf7   : > { %877 = vxpose.xlu0.b32.cont [11/16] %v845_v12, 128 }
  0xf9   : > { %1719 = vmatmul.mubr.f32.gmra.mrb[2].mxu0 %v613_v17 }
  0xfa   : > { %1721 = vmatprep.mubr.f32.mxu0 %v614_v18 }
  0xfb   : > { %878 = vxpose.xlu0.b32.cont [12/16] %v846_v13, 128 }
  0xfd   : > { %1722 = vmatmul.mubr.f32.gmra.mrb[4].mxu0 %v615_v20 }
  0xfe   : > { %1724 = vmatprep.mubr.f32.mxu0 %v616_v21  ;;  %v607_v21 = vld [vmem:[#allocation2 + $0x68] sm:$0xff] }
  0xff   : > { %879 = vxpose.xlu0.b32.cont [13/16] %v847_v16, 128  ;;  %v604_v16 = vld [vmem:[#allocation2 + $0x50] sm:$0xff] }
 0x101   : > { %1725 = vmatmul.mubr.f32.gmra.mrb[6].mxu0 %v617_v23 }
 0x102   : > { %1727 = vmatprep.mubr.f32.mxu0 %v618_v24 }
 0x103   : > { %880 = vxpose.xlu0.b32.cont [14/16] %v848_v19, 128 }
 0x105   : > { %1728 = vmatmul.mubr.f32.gmra.mrb[8].mxu0 %v619_v26 }
 0x106   : > { %1730 = vmatprep.mubr.f32.mxu0 %v620_v27  ;;  %v609_v27 = vld [vmem:[#allocation2 + $0x78] sm:$0xff] }
 0x107   : > { %881 = vxpose.xlu0.b32.cont [15/16] %v849_v22, 128  ;;  %v606_v22 = vld [vmem:[#allocation2 + $0x60] sm:$0xff] }
 0x109   : > { %1731 = vmatmul.mubr.f32.gmra.mrb[10].mxu0 %v621_v28  ;;  %v608_v28 = vld [vmem:[#allocation2 + $0x70] sm:$0xff] }
 0x10a   : > { %1733 = vmatprep.mubr.f32.mxu0 %v622_v29 }
 0x10b   : > { %882 = vxpose.xlu0.b32.end [16/16] %v850_v25, 128 }
 0x10d   : > { %1734 = vmatmul.mubr.f32.gmra.mrb[12].mxu0 %v623_v30 }
 0x10e   : > { %1736 = vmatprep.mubr.f32.mxu0 %v624_v31 }
 0x111   : > { %1737 = vmatmul.mubr.f32.gmra.mrb[14].mxu0 %v625_v32 }
 0x14f   : > { %v883_v33 = vpop.trf.xlu0 }
 0x150   : > { %1771 = vmatprep.mubr.f32.mxu1 %v883_v33  ;;  %v820_v33 = vld [vmem:[#allocation3 + $0x8] sm:$0xff] }
 0x153   : > { %v884_v34 = vpop.trf.xlu0 }
 0x154   : > { %1772 = vmatmul.mubr.f32.vlgmr.msra.gmra.mrb[0].mxu1 %v884_v34  ;;  %v819_v34 = vld [vmem:[#allocation3] sm:$0xff] }
 0x157   : > { %v885_v35 = vpop.trf.xlu0 }
 0x158   : > { %1774 = vmatprep.mubr.f32.mxu1 %v885_v35 }
 0x15b   : > { %v886_v36 = vpop.trf.xlu0 }
 0x15c   : > { %1775 = vmatmul.mubr.f32.gmra.mrb[2].mxu1 %v886_v36 }
 0x15f   : > { %v887_v37 = vpop.trf.xlu0 }
 0x160   : > { %1777 = vmatprep.mubr.f32.mxu1 %v887_v37 }
 0x163   : > { %v888_v38 = vpop.trf.xlu0 }
 0x164   : > { %1778 = vmatmul.mubr.f32.gmra.mrb[4].mxu1 %v888_v38 }
 0x167   : > { %v889_v39 = vpop.trf.xlu0 }
 0x168   : > { %1780 = vmatprep.mubr.f32.mxu1 %v889_v39  ;;  %v822_v39 = vld [vmem:[#allocation3 + $0x18] sm:$0xff] }
 0x16b   : > { %v890_v40 = vpop.trf.xlu0 }
 0x16c   : > { %1781 = vmatmul.mubr.f32.gmra.mrb[6].mxu1 %v890_v40  ;;  %v821_v40 = vld [vmem:[#allocation3 + $0x10] sm:$0xff] }
 0x16f   : > { %v891_v41 = vpop.trf.xlu0 }
 0x170   : > { %1783 = vmatprep.mubr.f32.mxu1 %v891_v41 }
 0x173   : > { %v892_v42 = vpop.trf.xlu0 }
 0x174   : > { %1784 = vmatmul.mubr.f32.gmra.mrb[8].mxu1 %v892_v42 }
 0x177   : > { %v893_v43 = vpop.trf.xlu0 }
 0x178   : > { %1786 = vmatprep.mubr.f32.mxu1 %v893_v43 }
 0x17b   : > { %v894_v44 = vpop.trf.xlu0 }
 0x17c   : > { %1787 = vmatmul.mubr.f32.gmra.mrb[10].mxu1 %v894_v44 }
 0x17f   : > { %v895_v45 = vpop.trf.xlu0 }
 0x180   : > { %1789 = vmatprep.mubr.f32.mxu1 %v895_v45  ;;  %v824_v45 = vld [vmem:[#allocation3 + $0x28] sm:$0xff] }
 0x183   : > { %v896_v46 = vpop.trf.xlu0 }
 0x184   : > { %1790 = vmatmul.mubr.f32.gmra.mrb[12].mxu1 %v896_v46  ;;  %v823_v46 = vld [vmem:[#allocation3 + $0x20] sm:$0xff] }
 0x187   : > { %v897_v47 = vpop.trf.xlu0 }
 0x188   : > { %1792 = vmatprep.mubr.f32.mxu1 %v897_v47 }
 0x18b   : > { %v898_v48 = vpop.trf.xlu0 }
 0x18c   : > { %1793 = vmatmul.mubr.f32.gmra.mrb[14].mxu1 %v898_v48 }
 0x1c8   : > { %v1717_v51 = vpop.f32.mrb[0].mxu0 }
 0x1c9   : > { %v788_v52 = vadd.f32 %v1717_v51, %v595_v49  ;;  %v708_v53 = vpop.f32.mrb[1].mxu0  ;;  %v826_v51 = vld [vmem:[#allocation3 + $0x38] sm:$0xff] }
 0x1ca   : > { %v787_v54 = vadd.f32 %v708_v53, %v594_v50 }
 0x1cb   : > { %804 = vst [vmem:[#allocation2 + $0x8] sm:$0xff] %v788_v52  ;;  %v825_v52 = vld [vmem:[#allocation3 + $0x30] sm:$0xff] }
 0x1cc   : > { %803 = vst [vmem:[#allocation2] sm:$0xff] %v787_v54  ;;  %v1720_v57 = vpop.f32.mrb[2].mxu0 }
 0x1cd   : > { %v790_v58 = vadd.f32 %v1720_v57, %v597_v55  ;;  %v718_v59 = vpop.f32.mrb[3].mxu0  ;;  %v828_v57 = vld [vmem:[#allocation3 + $0x48] sm:$0xff] }
 0x1ce   : > { %v789_v60 = vadd.f32 %v718_v59, %v596_v56 }
 0x1cf   : > { %806 = vst [vmem:[#allocation2 + $0x18] sm:$0xff] %v790_v58  ;;  %v827_v58 = vld [vmem:[#allocation3 + $0x40] sm:$0xff] }
 0x1d0   : > { %805 = vst [vmem:[#allocation2 + $0x10] sm:$0xff] %v789_v60  ;;  %v1723_v63 = vpop.f32.mrb[4].mxu0 }
 0x1d1   : > { %v792_v0 = vadd.f32 %v1723_v63, %v599_v61  ;;  %v728_v1 = vpop.f32.mrb[5].mxu0  ;;  %v830_v63 = vld [vmem:[#allocation3 + $0x58] sm:$0xff] }
 0x1d2   : > { %v791_v2 = vadd.f32 %v728_v1, %v598_v62 }
 0x1d3   : > { %808 = vst [vmem:[#allocation2 + $0x28] sm:$0xff] %v792_v0  ;;  %v829_v0 = vld [vmem:[#allocation3 + $0x50] sm:$0xff] }
 0x1d4   : > { %807 = vst [vmem:[#allocation2 + $0x20] sm:$0xff] %v791_v2  ;;  %v1726_v5 = vpop.f32.mrb[6].mxu0 }
 0x1d5   : > { %v794_v6 = vadd.f32 %v1726_v5, %v601_v3  ;;  %v738_v7 = vpop.f32.mrb[7].mxu0  ;;  %v832_v5 = vld [vmem:[#allocation3 + $0x68] sm:$0xff] }
 0x1d6   : > { %v793_v8 = vadd.f32 %v738_v7, %v600_v4 }
 0x1d7   : > { %810 = vst [vmem:[#allocation2 + $0x38] sm:$0xff] %v794_v6  ;;  %v831_v6 = vld [vmem:[#allocation3 + $0x60] sm:$0xff] }
 0x1d8   : > { %809 = vst [vmem:[#allocation2 + $0x30] sm:$0xff] %v793_v8  ;;  %v1729_v11 = vpop.f32.mrb[8].mxu0 }
 0x1d9   : > { %v796_v12 = vadd.f32 %v1729_v11, %v603_v9  ;;  %v748_v13 = vpop.f32.mrb[9].mxu0  ;;  %v834_v11 = vld [vmem:[#allocation3 + $0x78] sm:$0xff] }
 0x1da   : > { %v795_v14 = vadd.f32 %v748_v13, %v602_v10 }
 0x1db   : > { %812 = vst [vmem:[#allocation2 + $0x48] sm:$0xff] %v796_v12  ;;  %v833_v12 = vld [vmem:[#allocation3 + $0x70] sm:$0xff] }
 0x1dc   : > { %811 = vst [vmem:[#allocation2 + $0x40] sm:$0xff] %v795_v14  ;;  %v1732_v17 = vpop.f32.mrb[10].mxu0 }
 0x1dd   : > { %v798_v18 = vadd.f32 %v1732_v17, %v605_v15  ;;  %v758_v19 = vpop.f32.mrb[11].mxu0  ;;  %v1082_v17 = vld [vmem:[%s2589_s20 + $0x10] sm:$0xff] (!%p1607_p3) }
 0x1de   : > { %v797_v20 = vadd.f32 %v758_v19, %v604_v16  ;;  %v2236_v19 = vmov (!%p1607_p3), 0  }
 0x1df   : > { %814 = vst [vmem:[#allocation2 + $0x58] sm:$0xff] %v798_v18  ;;  %v1080_v18 = vld [vmem:[%s2589_s20] sm:$0xff] (!%p1607_p3)  ;;  %1992 = vset.pattern.permute.xlu1 (!%p1607_p3), %v2236_v19  ;;  %1991 = vset.pattern.permute.xlu0 (!%p1607_p3), %v2236_v19 }
 0x1e0   : > { %813 = vst [vmem:[#allocation2 + $0x50] sm:$0xff] %v797_v20  ;;  %v1735_v23 = vpop.f32.mrb[12].mxu0  ;;  %1124 = vperm.xlu1 (!%p1607_p3), %1992, %v1082_v17   ;;  %1114 = vperm.xlu0 (!%p1607_p3), %1991, %v1080_v18   ;;  %v1083_v20 = vld [vmem:[%s2589_s20 + $0x18] sm:$0xff] (!%p1607_p3) }
 0x1e1   : > { %v800_v24 = vadd.f32 %v1735_v23, %v607_v21  ;;  %v768_v25 = vpop.f32.mrb[13].mxu0  ;;  %v1081_v21 = vld [vmem:[%s2589_s20 + $0x8] sm:$0xff] (!%p1607_p3)  ;;  %v1084_v23 = vld [vmem:[%s2589_s20 + $0x20] sm:$0xff] (!%p1607_p3) }
 0x1e2   : > { %v799_v26 = vadd.f32 %v768_v25, %v606_v22  ;;  %v1085_v22 = vld [vmem:[%s2589_s20 + $0x28] sm:$0xff] (!%p1607_p3)  ;;  %v1086_v25 = vld [vmem:[%s2589_s20 + $0x30] sm:$0xff] (!%p1607_p3) }
 0x1e3   : > { %816 = vst [vmem:[#allocation2 + $0x68] sm:$0xff] %v800_v24  ;;  %v1087_v24 = vld [vmem:[%s2589_s20 + $0x38] sm:$0xff] (!%p1607_p3) }
 0x1e4   : > { %815 = vst [vmem:[#allocation2 + $0x60] sm:$0xff] %v799_v26  ;;  %v1738_v29 = vpop.f32.mrb[14].mxu0  ;;  %1129 = vperm.xlu1 (!%p1607_p3), %1992, %v1083_v20   ;;  %1119 = vperm.xlu0 (!%p1607_p3), %1991, %v1081_v21   ;;  %v1089_v26 = vld [vmem:[%s2589_s20 + $0x48] sm:$0xff] (!%p1607_p3) }
 0x1e5   : > { %v802_v30 = vadd.f32 %v1738_v29, %v609_v27  ;;  %v778_v31 = vpop.f32.mrb[15].mxu0  ;;  %v1088_v27 = vld [vmem:[%s2589_s20 + $0x40] sm:$0xff] (!%p1607_p3)  ;;  %v1090_v29 = vld [vmem:[%s2589_s20 + $0x50] sm:$0xff] (!%p1607_p3) }
 0x1e6   : > { %v801_v32 = vadd.f32 %v778_v31, %v608_v28  ;;  %v1091_v28 = vld [vmem:[%s2589_s20 + $0x58] sm:$0xff] (!%p1607_p3)  ;;  %v1092_v31 = vld [vmem:[%s2589_s20 + $0x60] sm:$0xff] (!%p1607_p3) }
 0x1e7   : > { %818 = vst [vmem:[#allocation2 + $0x78] sm:$0xff] %v802_v30  ;;  %v1093_v30 = vld [vmem:[%s2589_s20 + $0x68] sm:$0xff] (!%p1607_p3) }
 0x1e8   : > { %817 = vst [vmem:[#allocation2 + $0x70] sm:$0xff] %v801_v32  ;;  %1139 = vperm.xlu1 (!%p1607_p3), %1992, %v1085_v22   ;;  %1134 = vperm.xlu0 (!%p1607_p3), %1991, %v1084_v23   ;;  %v1095_v32 = vld [vmem:[%s2589_s20 + $0x78] sm:$0xff] (!%p1607_p3)  ;;  %v1101_v23 = vld [vmem:[#allocation2 + $0x28] sm:$0xff] (!%p1607_p3) }
 0x1ec   : > { %1149 = vperm.xlu1 (!%p1607_p3), %1992, %v1087_v24   ;;  %1144 = vperm.xlu0 (!%p1607_p3), %1991, %v1086_v25   ;;  %v1100_v24 = vld [vmem:[#allocation2 + $0x20] sm:$0xff] (!%p1607_p3) }
 0x1f0   : > { %1159 = vperm.xlu1 (!%p1607_p3), %1992, %v1089_v26   ;;  %1154 = vperm.xlu0 (!%p1607_p3), %1991, %v1088_v27  }
 0x1f4   : > { %1169 = vperm.xlu1 (!%p1607_p3), %1992, %v1091_v28   ;;  %1164 = vperm.xlu0 (!%p1607_p3), %1991, %v1090_v29  }
 0x1f8   : > { %1179 = vperm.xlu1 (!%p1607_p3), %1992, %v1093_v30   ;;  %1174 = vperm.xlu0 (!%p1607_p3), %1991, %v1092_v31  }
 0x1fc   : > { %1189 = vperm.xlu1 (!%p1607_p3), %1992, %v1095_v32  }
 0x227   : > { %v1773_v35 = vpop.f32.mrb[0].mxu1 }
 0x228   : > { %v1045_v36 = vadd.f32 %v1773_v35, %v820_v33  ;;  %v965_v37 = vpop.f32.mrb[1].mxu1  ;;  %v1094_v33 = vld [vmem:[%s2589_s20 + $0x70] sm:$0xff] (!%p1607_p3)  ;;  %v1208_v35 = vld [vmem:[%s2594_s17] sm:$0xff] (!%p1607_p3) }
 0x229   : > { %v1044_v38 = vadd.f32 %v965_v37, %v819_v34  ;;  %1184 = vperm.xlu0 (!%p1607_p3), %1991, %v1094_v33   ;;  %v1209_v34 = vld [vmem:[%s2594_s17 + $0x8] sm:$0xff] (!%p1607_p3)  ;;  %v1210_v37 = vld [vmem:[%s2594_s17 + $0x10] sm:$0xff] (!%p1607_p3) }
 0x22a   : > { %1061 = vst [vmem:[#allocation3 + $0x8] sm:$0xff] %v1045_v36  ;;  %1247 = vperm.xlu1 (!%p1607_p3), %1992, %v1209_v34   ;;  %v1211_v36 = vld [vmem:[%s2594_s17 + $0x18] sm:$0xff] (!%p1607_p3) }
 0x22b   : > { %1060 = vst [vmem:[#allocation3] sm:$0xff] %v1044_v38  ;;  %v1213_v38 = vld [vmem:[%s2594_s17 + $0x28] sm:$0xff] (!%p1607_p3) }
 0x22d   : > { %1242 = vperm.xlu0 (!%p1607_p3), %1991, %v1208_v35  }
 0x22e   : > { %1257 = vperm.xlu1 (!%p1607_p3), %1992, %v1211_v36  }
 0x22f   : > { %v1776_v41 = vpop.f32.mrb[2].mxu1 }
 0x230   : > { %v1047_v42 = vadd.f32 %v1776_v41, %v822_v39  ;;  %v975_v43 = vpop.f32.mrb[3].mxu1  ;;  %v1212_v39 = vld [vmem:[%s2594_s17 + $0x20] sm:$0xff] (!%p1607_p3)  ;;  %v1214_v41 = vld [vmem:[%s2594_s17 + $0x30] sm:$0xff] (!%p1607_p3) }
 0x231   : > { %v1046_v44 = vadd.f32 %v975_v43, %v821_v40  ;;  %1252 = vperm.xlu0 (!%p1607_p3), %1991, %v1210_v37   ;;  %v1215_v40 = vld [vmem:[%s2594_s17 + $0x38] sm:$0xff] (!%p1607_p3)  ;;  %v1216_v43 = vld [vmem:[%s2594_s17 + $0x40] sm:$0xff] (!%p1607_p3) }
 0x232   : > { %1063 = vst [vmem:[#allocation3 + $0x18] sm:$0xff] %v1047_v42  ;;  %1267 = vperm.xlu1 (!%p1607_p3), %1992, %v1213_v38   ;;  %v1217_v42 = vld [vmem:[%s2594_s17 + $0x48] sm:$0xff] (!%p1607_p3)  ;;  %v1103_v37 = vld [vmem:[#allocation2 + $0x38] sm:$0xff] (!%p1607_p3)  ;;  %v1102_v38 = vld [vmem:[#allocation2 + $0x30] sm:$0xff] (!%p1607_p3) }
 0x233   : > { %1062 = vst [vmem:[#allocation3 + $0x10] sm:$0xff] %v1046_v44  ;;  %v1219_v44 = vld [vmem:[%s2594_s17 + $0x58] sm:$0xff] (!%p1607_p3) }
 0x235   : > { %1262 = vperm.xlu0 (!%p1607_p3), %1991, %v1212_v39  }
 0x236   : > { %1277 = vperm.xlu1 (!%p1607_p3), %1992, %v1215_v40  }
 0x237   : > { %v1779_v47 = vpop.f32.mrb[4].mxu1 }
 0x238   : > { %v1049_v48 = vadd.f32 %v1779_v47, %v824_v45  ;;  %v985_v49 = vpop.f32.mrb[5].mxu1  ;;  %v1218_v45 = vld [vmem:[%s2594_s17 + $0x50] sm:$0xff] (!%p1607_p3)  ;;  %v1220_v47 = vld [vmem:[%s2594_s17 + $0x60] sm:$0xff] (!%p1607_p3) }
 0x239   : > { %v1048_v50 = vadd.f32 %v985_v49, %v823_v46  ;;  %1272 = vperm.xlu0 (!%p1607_p3), %1991, %v1214_v41   ;;  %v1221_v46 = vld [vmem:[%s2594_s17 + $0x68] sm:$0xff] (!%p1607_p3)  ;;  %v1222_v49 = vld [vmem:[%s2594_s17 + $0x70] sm:$0xff] (!%p1607_p3) }
 0x23a   : > { %1065 = vst [vmem:[#allocation3 + $0x28] sm:$0xff] %v1049_v48  ;;  %1287 = vperm.xlu1 (!%p1607_p3), %1992, %v1217_v42   ;;  %v1223_v48 = vld [vmem:[%s2594_s17 + $0x78] sm:$0xff] (!%p1607_p3) }
 0x23b   : > { %1064 = vst [vmem:[#allocation3 + $0x20] sm:$0xff] %v1048_v50 }
 0x23d   : > { %1282 = vperm.xlu0 (!%p1607_p3), %1991, %v1216_v43  }
 0x23e   : > { %1297 = vperm.xlu1 (!%p1607_p3), %1992, %v1219_v44  }
 0x23f   : > { %v1782_v53 = vpop.f32.mrb[6].mxu1 }
 0x240   : > { %v1051_v54 = vadd.f32 %v1782_v53, %v826_v51  ;;  %v995_v55 = vpop.f32.mrb[7].mxu1 }
 0x241   : > { %v1050_v56 = vadd.f32 %v995_v55, %v825_v52  ;;  %1292 = vperm.xlu0 (!%p1607_p3), %1991, %v1218_v45   ;;  %v1229_v29 = vld [vmem:[#allocation3 + $0x28] sm:$0xff] (!%p1607_p3) }
 0x242   : > { %1067 = vst [vmem:[#allocation3 + $0x38] sm:$0xff] %v1051_v54  ;;  %1307 = vperm.xlu1 (!%p1607_p3), %1992, %v1221_v46   ;;  %v1228_v30 = vld [vmem:[#allocation3 + $0x20] sm:$0xff] (!%p1607_p3) }
 0x243   : > { %1066 = vst [vmem:[#allocation3 + $0x30] sm:$0xff] %v1050_v56 }
 0x245   : > { %1302 = vperm.xlu0 (!%p1607_p3), %1991, %v1220_v47  }
 0x246   : > { %1317 = vperm.xlu1 (!%p1607_p3), %1992, %v1223_v48  }
 0x247   : > { %v1785_v59 = vpop.f32.mrb[8].mxu1 }
 0x248   : > { %v1053_v60 = vadd.f32 %v1785_v59, %v828_v57  ;;  %v1005_v61 = vpop.f32.mrb[9].mxu1 }
 0x249   : > { %v1052_v62 = vadd.f32 %v1005_v61, %v827_v58  ;;  %1312 = vperm.xlu0 (!%p1607_p3), %1991, %v1222_v49   ;;  %v1231_v43 = vld [vmem:[#allocation3 + $0x38] sm:$0xff] (!%p1607_p3) }
 0x24a   : > { %1069 = vst [vmem:[#allocation3 + $0x48] sm:$0xff] %v1053_v60  ;;  %v1230_v44 = vld [vmem:[#allocation3 + $0x30] sm:$0xff] (!%p1607_p3) }
 0x24b   : > { %1068 = vst [vmem:[#allocation3 + $0x40] sm:$0xff] %v1052_v62 }
 0x24f   : > { %v1788_v1 = vpop.f32.mrb[10].mxu1 }
 0x250   : > { %v1055_v2 = vadd.f32 %v1788_v1, %v830_v63  ;;  %v1015_v3 = vpop.f32.mrb[11].mxu1 }
 0x251   : > { %v1054_v4 = vadd.f32 %v1015_v3, %v829_v0  ;;  %v1097_v3 = vld [vmem:[#allocation2 + $0x8] sm:$0xff] (!%p1607_p3) }
 0x252   : > { %1071 = vst [vmem:[#allocation3 + $0x58] sm:$0xff] %v1055_v2  ;;  %v1096_v2 = vld [vmem:[#allocation2] sm:$0xff] (!%p1607_p3) }
 0x253   : > { %1070 = vst [vmem:[#allocation3 + $0x50] sm:$0xff] %v1054_v4  ;;  %v1225_v4 = vld [vmem:[#allocation3 + $0x8] sm:$0xff] (!%p1607_p3) }
 0x257   : > { %v1791_v7 = vpop.f32.mrb[12].mxu1 }
 0x258   : > { %v1057_v8 = vadd.f32 %v1791_v7, %v832_v5  ;;  %v1025_v9 = vpop.f32.mrb[13].mxu1  ;;  %v1224_v5 = vld [vmem:[#allocation3] sm:$0xff] (!%p1607_p3) }
 0x259   : > { %v1056_v10 = vadd.f32 %v1025_v9, %v831_v6 }
 0x25a   : > { %1073 = vst [vmem:[#allocation3 + $0x68] sm:$0xff] %v1057_v8  ;;  %v1098_v8 = vld [vmem:[#allocation2 + $0x10] sm:$0xff] (!%p1607_p3) }
 0x25b   : > { %1072 = vst [vmem:[#allocation3 + $0x60] sm:$0xff] %v1056_v10  ;;  %v1099_v10 = vld [vmem:[#allocation2 + $0x18] sm:$0xff] (!%p1607_p3) }
 0x25d   : > { %1079 = sbr.rel (%p1607_p3) target bundleno = 720 (0x2d0), region = 106 }
 0x25f   : > { %v1794_v13 = vpop.f32.mrb[14].mxu1  ;;  %v1125_v50 = vpop.permute.xlu1 (!%p1607_p3), %1124 }
 0x260   : > { %v1059_v14 = vadd.f32 %v1794_v13, %v834_v11  ;;  %v1035_v15 = vpop.f32.mrb[15].mxu1  ;;  %v1115_v51 = vpop.permute.xlu0 (!%p1607_p3), %1114  ;;  %v1194_v19 = vmul.f32 (!%p1607_p3), %v1125_v50, %v1098_v8 }
 0x261   : > { %v1058_v16 = vadd.f32 %v1035_v15, %v833_v12  ;;  %v1192_v9 = vmul.f32 (!%p1607_p3), %v1115_v51, %v1096_v2  ;;  %v1227_v15 = vld [vmem:[#allocation3 + $0x18] sm:$0xff] (!%p1607_p3)  ;;  %v1105_v51 = vld [vmem:[#allocation2 + $0x48] sm:$0xff] (!%p1607_p3) }
 0x262   : > { %1075 = vst [vmem:[#allocation3 + $0x78] sm:$0xff] %v1059_v14  ;;  %v2717_v14 = vld [vmem:[%s2916_s23] ss:$0 sm:$0xff] (!%p1607_p3) }
 0x263   : > { %1074 = vst [vmem:[#allocation3 + $0x70] sm:$0xff] %v1058_v16  ;;  %v1130_v52 = vpop.permute.xlu1 (!%p1607_p3), %1129  ;;  %v1226_v16 = vld [vmem:[#allocation3 + $0x10] sm:$0xff] (!%p1607_p3) }
 0x264   : > { %v1120_v53 = vpop.permute.xlu0 %1119  ;;  %v1195_v20 = vmul.f32 %v1130_v52, %v1099_v10  ;;  %v1104_v52 = vld [vmem:[#allocation2 + $0x40] sm:$0xff]  ;;  %v1106_v10 = vld [vmem:[#allocation2 + $0x50] sm:$0xff] }
 0x265   : > { %v1193_v11 = vmul.f32 %v1120_v53, %v1097_v3  ;;  %v1233_v3 = vld [vmem:[#allocation3 + $0x48] sm:$0xff] }
 0x267   : > { %v1140_v54 = vpop.permute.xlu1 %1139 }
 0x268   : > { %v1135_v55 = vpop.permute.xlu0 %1134  ;;  %v1197_v33 = vmul.f32 %v1140_v54, %v1101_v23  ;;  %v1108_v23 = vld [vmem:[#allocation2 + $0x60] sm:$0xff] }
 0x269   : > { %v1196_v34 = vmul.f32 %v1135_v55, %v1100_v24 }
 0x26b   : > { %v1150_v56 = vpop.permute.xlu1 %1149 }
 0x26c   : > { %v1145_v57 = vpop.permute.xlu0 %1144  ;;  %v1199_v47 = vmul.f32 %v1150_v56, %v1103_v37 }
 0x26d   : > { %v1198_v48 = vmul.f32 %v1145_v57, %v1102_v38 }
 0x26f   : > { %v2698_v58 = vpop.permute.xlu1 %1159 }
 0x270   : > { %v2700_v59 = vpop.permute.xlu0 %1154  ;;  %v1201_v56 = vmul.f32 %v2698_v58, %v1105_v51 }
 0x271   : > { %v1200_v57 = vmul.f32 %v2700_v59, %v1104_v52 }
 0x273   : > { %v2702_v60 = vpop.permute.xlu1 %1169 }
 0x274   : > { %v2704_v61 = vpop.permute.xlu0 %1164 }
 0x277   : > { %v2706_v62 = vpop.permute.xlu1 %1179 }
 0x278   : > { %v2708_v63 = vpop.permute.xlu0 %1174 }
 0x27b   : > { %v2710_v0 = vpop.permute.xlu1 %1189 }
 0x2a8   : > { %v2712_v1 = vpop.permute.xlu0 %1184 }
 0x2a9   : > { %v1248_v6 = vpop.permute.xlu1 %1247 }
 0x2aa   : > { %v1321_v12 = vmul.f32 %v1248_v6, %v1225_v4  ;;  %v1232_v4 = vld [vmem:[#allocation3 + $0x40] sm:$0xff] }
 0x2ac   : > { %v1243_v7 = vpop.permute.xlu0 %1242  ;;  %v1337_v17 = vadd.f32 %v1321_v12, %v1193_v11 }
 0x2ad   : > { %v1320_v13 = vmul.f32 %v1243_v7, %v1224_v5  ;;  %v1258_v21 = vpop.permute.xlu1 %1257 }
 0x2ae   : > { %v1360_v25 = vadd.f32 %v2717_v14, %v1337_v17  ;;  %v1323_v27 = vmul.f32 %v1258_v21, %v1227_v15  ;;  %v1234_v17 = vld [vmem:[#allocation3 + $0x50] sm:$0xff] }
 0x2af   : > { %v1336_v18 = vadd.f32 %v1320_v13, %v1192_v9  ;;  %v1107_v9 = vld [vmem:[#allocation2 + $0x58] sm:$0xff] }
 0x2b0   : > { %v1253_v22 = vpop.permute.xlu0 %1252  ;;  %1376 = vst [vmem:[%s2598_s26 + $0x8] sm:$0xff] %v1360_v25  ;;  %v1339_v31 = vadd.f32 %v1323_v27, %v1195_v20  ;;  %v1203_v59 = vmul.f32 %v2702_v60, %v1107_v9 }
 0x2b1   : > { %v1359_v26 = vadd.f32 %v2717_v14, %v1336_v18  ;;  %v1322_v28 = vmul.f32 %v1253_v22, %v1226_v16  ;;  %v1268_v35 = vpop.permute.xlu1 %1267  ;;  %v1235_v16 = vld [vmem:[#allocation3 + $0x58] sm:$0xff]  ;;  %v1109_v22 = vld [vmem:[#allocation2 + $0x68] sm:$0xff] }
 0x2b2   : > { %v1362_v39 = vadd.f32 %v2717_v14, %v1339_v31  ;;  %v1325_v41 = vmul.f32 %v1268_v35, %v1229_v29  ;;  %v1236_v29 = vld [vmem:[#allocation3 + $0x60] sm:$0xff]  ;;  %v1204_v31 = vmul.f32 %v2708_v63, %v1108_v23  ;;  %v1110_v35 = vld [vmem:[#allocation2 + $0x70] sm:$0xff] }
 0x2b3   : > { %1375 = vst [vmem:[%s2598_s26] sm:$0xff] %v1359_v26  ;;  %v1338_v32 = vadd.f32 %v1322_v28, %v1194_v19  ;;  %v1202_v19 = vmul.f32 %v2704_v61, %v1106_v10  ;;  %v1237_v28 = vld [vmem:[#allocation3 + $0x68] sm:$0xff]  ;;  %v1205_v61 = vmul.f32 %v2706_v62, %v1109_v22 }
 0x2b4   : > { %v1263_v36 = vpop.permute.xlu0 %1262  ;;  %1378 = vst [vmem:[%s2598_s26 + $0x18] sm:$0xff] %v1362_v39  ;;  %v1341_v45 = vadd.f32 %v1325_v41, %v1197_v33  ;;  %v1238_v41 = vld [vmem:[#allocation3 + $0x70] sm:$0xff] }
 0x2b5   : > { %v1361_v40 = vadd.f32 %v2717_v14, %v1338_v32  ;;  %v1324_v42 = vmul.f32 %v1263_v36, %v1228_v30  ;;  %v1278_v49 = vpop.permute.xlu1 %1277 }
 0x2b6   : > { %v1364_v53 = vadd.f32 %v2717_v14, %v1341_v45  ;;  %v1327_v55 = vmul.f32 %v1278_v49, %v1231_v43  ;;  %v1206_v43 = vmul.f32 %v2712_v1, %v1110_v35 }
 0x2b7   : > { %1377 = vst [vmem:[%s2598_s26 + $0x10] sm:$0xff] %v1361_v40  ;;  %v1340_v46 = vadd.f32 %v1324_v42, %v1196_v34  ;;  %v1111_v34 = vld [vmem:[#allocation2 + $0x78] sm:$0xff] }
 0x2b8   : > { %v1273_v50 = vpop.permute.xlu0 %1272  ;;  %1380 = vst [vmem:[%s2598_s26 + $0x28] sm:$0xff] %v1364_v53  ;;  %v1343_v5 = vadd.f32 %v1327_v55, %v1199_v47  ;;  %v1239_v40 = vld [vmem:[#allocation3 + $0x78] sm:$0xff]  ;;  %v1207_v63 = vmul.f32 %v2710_v0, %v1111_v34 }
 0x2b9   : > { %v1363_v54 = vadd.f32 %v2717_v14, %v1340_v46  ;;  %v1326_v2 = vmul.f32 %v1273_v50, %v1230_v44  ;;  %v1288_v7 = vpop.permute.xlu1 %1287 }
 0x2ba   : > { %v1366_v11 = vadd.f32 %v2717_v14, %v1343_v5  ;;  %v1329_v13 = vmul.f32 %v1288_v7, %v1233_v3 }
 0x2bb   : > { %1379 = vst [vmem:[%s2598_s26 + $0x20] sm:$0xff] %v1363_v54  ;;  %v1342_v6 = vadd.f32 %v1326_v2, %v1198_v48 }
 0x2bc   : > { %v1283_v8 = vpop.permute.xlu0 %1282  ;;  %1382 = vst [vmem:[%s2598_s26 + $0x38] sm:$0xff] %v1366_v11  ;;  %v1345_v18 = vadd.f32 %v1329_v13, %v1201_v56 }
 0x2bd   : > { %v1365_v12 = vadd.f32 %v2717_v14, %v1342_v6  ;;  %v1328_v15 = vmul.f32 %v1283_v8, %v1232_v4  ;;  %v1298_v20 = vpop.permute.xlu1 %1297 }
 0x2be   : > { %v1368_v24 = vadd.f32 %v2717_v14, %v1345_v18  ;;  %v1331_v26 = vmul.f32 %v1298_v20, %v1235_v16 }
 0x2bf   : > { %1381 = vst [vmem:[%s2598_s26 + $0x30] sm:$0xff] %v1365_v12  ;;  %v1344_v58 = vadd.f32 %v1328_v15, %v1200_v57 }
 0x2c0   : > { %v1293_v21 = vpop.permute.xlu0 %1292  ;;  %1384 = vst [vmem:[%s2598_s26 + $0x48] sm:$0xff] %v1368_v24  ;;  %v1347_v30 = vadd.f32 %v1331_v26, %v1203_v59 }
 0x2c1   : > { %v1367_v25 = vadd.f32 %v2717_v14, %v1344_v58  ;;  %v1330_v27 = vmul.f32 %v1293_v21, %v1234_v17  ;;  %v1308_v32 = vpop.permute.xlu1 %1307 }
 0x2c2   : > { %v1370_v36 = vadd.f32 %v2717_v14, %v1347_v30  ;;  %v1333_v38 = vmul.f32 %v1308_v32, %v1237_v28 }
 0x2c3   : > { %1383 = vst [vmem:[%s2598_s26 + $0x40] sm:$0xff] %v1367_v25  ;;  %v1346_v60 = vadd.f32 %v1330_v27, %v1202_v19 }
 0x2c4   : > { %v1303_v33 = vpop.permute.xlu0 %1302  ;;  %1386 = vst [vmem:[%s2598_s26 + $0x58] sm:$0xff] %v1370_v36  ;;  %v1349_v42 = vadd.f32 %v1333_v38, %v1205_v61 }
 0x2c5   : > { %v1369_v37 = vadd.f32 %v2717_v14, %v1346_v60  ;;  %v1332_v39 = vmul.f32 %v1303_v33, %v1236_v29  ;;  %v1318_v44 = vpop.permute.xlu1 %1317 }
 0x2c6   : > { %v1372_v46 = vadd.f32 %v2717_v14, %v1349_v42  ;;  %v1335_v48 = vmul.f32 %v1318_v44, %v1239_v40 }
 0x2c7   : > { %1385 = vst [vmem:[%s2598_s26 + $0x50] sm:$0xff] %v1369_v37  ;;  %v1348_v62 = vadd.f32 %v1332_v39, %v1204_v31 }
 0x2c8   : > { %v1313_v45 = vpop.permute.xlu0 %1312  ;;  %1388 = vst [vmem:[%s2598_s26 + $0x68] sm:$0xff] %v1372_v46  ;;  %v1351_v50 = vadd.f32 %v1335_v48, %v1207_v63 }
 0x2c9   : > { %v1371_v47 = vadd.f32 %v2717_v14, %v1348_v62  ;;  %v1334_v49 = vmul.f32 %v1313_v45, %v1238_v41 }
 0x2ca   : > { %v1374_v52 = vadd.f32 %v2717_v14, %v1351_v50 }
 0x2cb   : > { %1387 = vst [vmem:[%s2598_s26 + $0x60] sm:$0xff] %v1371_v47  ;;  %v1350_v51 = vadd.f32 %v1334_v49, %v1206_v43 }
 0x2cc   : > { %1390 = vst [vmem:[%s2598_s26 + $0x78] sm:$0xff] %v1374_v52 }
 0x2cd   : > { %v1373_v53 = vadd.f32 %v2717_v14, %v1350_v51 }
 0x2cf   : > { %1389 = vst [vmem:[%s2598_s26 + $0x70] sm:$0xff] %v1373_v53 }
 0x2d0 PF: > { %s2917_s16 = sld [smem:[#allocation21_spill]]  ;;  %s2919_s27 = sld [smem:[#allocation29_spill]] }
 0x2d1   : > { %s2920_s21 = sld [smem:[#allocation36_spill]]  ;;  %s1405_s5 = sshll.u32 %s2598_s26, 4  ;;  %s2766_s5 = int_to_ptr.vmem [resolvable:$true] %s1405_s5 }
 0x2d2   : > { %s2770_s10 = scalar_lea.sflag [#allocation7], %s538_s18  ;;  %s2077_s0 = scalar_lea.vmem %s2766_s5, 2048 }
 0x2d3   : > { %p2078_p13 = scmp.ne.s32.totalorder %s2766_s5, %s2077_s0  ;;  %s2237_s20 = smov [#allocation11]  }
 0x2d4   : > { %s2081_s25 = sshll.u32 %s2237_s20, 4  ;;  %s2082_s25 = int_to_ptr.vmem [resolvable:$false] %s2081_s25 }
 0x2d5   : > { %s2083_s28 = scalar_lea.vmem %s2082_s25, 4096  ;;  %p2084_p5 = scmp.lt.s32.totalorder %s2766_s5, %s2082_s25 }
 0x2d6   : > { %s1618_s6 = sshll.u32 %s2917_s16, 11  ;;  %p2921_p7 = scmp.ne.s32.totalorder %s2919_s27, 0 }
 0x2d7   : > { %s2763_s4 = scalar_lea.hbm %s2920_s21, %s1618_s6  ;;  %p2085_p6 = scmp.lt.s32.totalorder %s2083_s28, %s2077_s0 }
 0x2d8   : > { %p2079_p0 = pnand %p2078_p13, %p2921_p7 }
 0x2d9   : > { %p2086_p2 = por %p2085_p6, %p2084_p5 }
 0x2da   : > { %p2080_p9 = pneg %p2079_p0 }
 0x2dc   : > { %p2087_p10 = pnand %p2086_p2, %p2080_p9 }
 0x2de   : > { %2090 = shalt.err (!%p2087_p10)
}
 0x2df   : > { %s2091_s18 = scalar_lea.hbm %s2763_s4, 2048  ;;  %s2095_s19 = scalar_lea.hbm %s2920_s21, 4096 }
 0x2e0   : > { %p2092_p11 = scmp.ne.s32.totalorder %s2763_s4, %s2091_s18  ;;  %p2096_p4 = scmp.lt.u32.totalorder %s2763_s4, %s2920_s21 }
 0x2e1   : > { %p2097_p8 = scmp.lt.u32.totalorder %s2095_s19, %s2091_s18  ;;  %p2099_p13 = scmp.lt.u32.totalorder %s2091_s18, %s2763_s4 }
 0x2e2   : > { %p2093_p1 = pnand %p2092_p11, %p2921_p7 }
 0x2e3   : > { %p2098_p3 = por %p2097_p8, %p2096_p4 }
 0x2e4   : > { %p2094_p12 = pneg %p2093_p1 }
 0x2e5   : > { %p2100_p0 = por %p2099_p13, %p2098_p3 }
 0x2e7   : > { %p2101_p9 = pnand %p2100_p0, %p2094_p12 }
 0x2e9   : > { %2104 = shalt.err (!%p2101_p9)
}
 0x2ea   : > { %s2238_s2 = smov 128   ;;  %s2239_s15 = smov 8  }
 0x2eb   : > { %1865 = dma.vmem_to_hbm [thread:$0]  (%p2921_p7), %s2766_s5, 2048, %s2763_s4, %s2770_s10, %s2238_s2, %s2238_s2, %s2239_s15  }
 0x2ec PF: > { %s2922_s24 = sld [smem:[#allocation15_spill]]  ;;  %s2923_s23 = sld [smem:[#allocation30_spill]] }
 0x2ed   : > { %p1871_p5 = scmp.ge.s32.totalorder %s2227_s14, 2 }
 0x2f2   : > { %s1420_s16 = sand.u32 1, %s2922_s24   ;;  %p2924_p6 = scmp.ne.s32.totalorder %s2923_s23, 0 }
 0x2f3   : > { %s1421_s30 = scalar_lea.sflag [#allocation7], %s1420_s16 }
 0x2f4   : > { %p1868_p2 = pnand %p1871_p5, %p2924_p6 }
 0x2f6   : > { %2170 = dma.done.wait (!%p1868_p2), %s1421_s30, 2048  }
 0x2f7   : > { %2172 = vsyncadd (!%p1868_p2), %s1421_s30, 4294965248  ;;  %s26_s14 = sadd.s32 1, %s2227_s14   ;;  %s2926_s24 = sld [smem:[#allocation16_spill]] }
 0x2f8   : > { %p2799_p10 = scmp.ge.s32.totalorder %s26_s14, 6   ;;  %s2927_s25 = sld [smem:[#allocation17_spill]] }
 0x2f9   : > { %s2928_s26 = sld [smem:[#allocation28_spill]]  ;;  %s2929_s27 = sld [smem:[#allocation18_spill]] }
 0x2fa   : > { %s2930_s28 = sld [smem:[#allocation19_spill]]  ;;  %s2931_s29 = sld [smem:[#allocation25_spill]] }
 0x2fb   : > { %s2932_s22 = sld [smem:[#allocation26_spill]]  ;;  %s2933_s4 = sld [smem:[#allocation23_spill]] }
 0x2fc   : > { %s2934_s5 = sld [smem:[#allocation24_spill]]  ;;  %s2935_s30 = smov %s2203_s8 }
 0x2fd   : > { %s2936_s8 = smov %s2207_s9  ;;  %s2938_s10 = smov %s2219_s12 }
 0x2fe   : > { %s2939_s11 = smov %s2223_s13  ;;  %25 = sbr.rel (!%p2799_p10) target bundleno = 19 (0x13), region = 177 }
 0x301   : > { %s2937_s9 = smov %s2932_s22  ;;  %s2940_s12 = smov %s2933_s4 }
 0x302   : > { %s2941_s13 = smov %s2934_s5 }
 0x305   :  { %1426 = vsyncpa [#allocation6], 1 }
 0x306   :  { %1428 = vsyncpa [#allocation6 + $0x1], 1 }
 0x307   :  { %1429 = vsyncpa [#allocation9], 1 }
 0x308   :  { %1431 = vsyncpa [#allocation9 + $0x1], 1 }
 0x309   :  { %1432 = vsyncpa [#allocation7], 1 }
 0x30a   :  { %1434 = vsyncpa [#allocation7 + $0x1], 1 }

</bundles_post_ra>
